<compile_context>
chip_gen: v7x
topology: tpu7x:2x2x1
jax: 0.10.0
libtpu: 0.0.40
codegen_flags: <defaults>
</compile_context>

<pallas_src>
import functools

import jax
import jax.numpy as jnp
from jax.experimental import pallas as pl
from jax.experimental.pallas import tpu as pltpu


# ----------------------------------------------------------------------------
# Pallas kernel: both LSTM directions, full recurrence in one kernel body.
# ----------------------------------------------------------------------------
def _bidir_lstm_kernel(lens_ref, xpf_ref, xpb_ref, whf_ref, whb_ref,
                       out_ref, hn_ref, cn_ref, *, seq_len, hidden, unroll):
    H = hidden
    B = xpf_ref.shape[1]

    # Resident in VMEM for the whole scan.
    lens = lens_ref[...]           # (B, 1) int32
    whh_f = whf_ref[...]           # (H, 4H), gate columns [i|f|o|g]
    whh_b = whb_ref[...]           # (H, 4H)

    def cell(xp, h, c, whh):
        # xp already contains x @ W_ih^T + (b_ih + b_hh)  -> only one small
        # MXU matmul on the per-step critical path.
        gates = xp + jnp.dot(h, whh, preferred_element_type=jnp.float32)
        sig = jax.nn.sigmoid(gates[:, :3 * H])     # contiguous [i | f | o]
        i_g = sig[:, 0 * H:1 * H]
        f_g = sig[:, 1 * H:2 * H]
        o_g = sig[:, 2 * H:3 * H]
        g_g = jnp.tanh(gates[:, 3 * H:])           # [g]
        c_new = f_g * c + i_g * g_g
        h_new = o_g * jnp.tanh(c_new)
        return h_new, c_new

    def step(i, carry):
        h_f, c_f, h_b, c_b = carry
        t_b = seq_len - 1 - i                      # backward time index

        # Two independent chains -> the LLO scheduler interleaves them.
        hf_new, cf_new = cell(xpf_ref[i], h_f, c_f, whh_f)
        hb_new, cb_new = cell(xpb_ref[t_b], h_b, c_b, whh_b)

        # Packed-sequence masks: only batch entries with t < length update.
        m_f = lens > i                             # (B, 1)
        m_b = lens > t_b
        h_f = jnp.where(m_f, hf_new, h_f)
        c_f = jnp.where(m_f, cf_new, c_f)
        h_b = jnp.where(m_b, hb_new, h_b)
        c_b = jnp.where(m_b, cb_new, c_b)

        # Concatenated output written directly: [forward | backward] lanes.
        # (pad_packed_sequence writes zeros at padded positions.)
        out_ref[i, :, :H] = jnp.where(m_f, hf_new, 0.0).astype(out_ref.dtype)
        out_ref[t_b, :, H:] = jnp.where(m_b, hb_new, 0.0).astype(out_ref.dtype)
        return h_f, c_f, h_b, c_b

    z = jnp.zeros((B, H), jnp.float32)
    h_f, c_f, h_b, c_b = jax.lax.fori_loop(0, seq_len, step, (z, z, z, z),
                                           unroll=unroll)

    # Final states written exactly once.
    hn_ref[0] = h_f.astype(hn_ref.dtype)
    hn_ref[1] = h_b.astype(hn_ref.dtype)
    cn_ref[0] = c_f.astype(cn_ref.dtype)
    cn_ref[1] = c_b.astype(cn_ref.dtype)


def _bidir_lstm(lens2d, xproj_f, xproj_b, whh_f, whh_b, *, unroll):
    """lens2d: (B,1) i32; xproj_f/xproj_b: (T,B,4H) f32 (bias folded in);
    whh_f/whh_b: (H,4H) f32.  Returns out (T,B,2H), h_n (2,B,H), c_n (2,B,H)."""
    T, B, G4 = xproj_f.shape
    H = G4 // 4

    kernel = functools.partial(_bidir_lstm_kernel, seq_len=T, hidden=H,
                               unroll=unroll)

    out_shapes = (jax.ShapeDtypeStruct((T, B, 2 * H), jnp.float32),
                  jax.ShapeDtypeStruct((2, B, H), jnp.float32),
                  jax.ShapeDtypeStruct((2, B, H), jnp.float32))

    grid_spec = pltpu.PrefetchScalarGridSpec(
        num_scalar_prefetch=0,
        grid=(1,),                                         # single fused step
        in_specs=[
            pl.BlockSpec((B, 1), lambda i: (0, 0)),        # lengths
            pl.BlockSpec((T, B, G4), lambda i: (0, 0, 0)),  # x_proj fwd
            pl.BlockSpec((T, B, G4), lambda i: (0, 0, 0)),  # x_proj bwd
            pl.BlockSpec((H, G4), lambda i: (0, 0)),        # W_hh^T fwd
            pl.BlockSpec((H, G4), lambda i: (0, 0)),        # W_hh^T bwd
        ],
        out_specs=[
            pl.BlockSpec((T, B, 2 * H), lambda i: (0, 0, 0)),   # outputs
            pl.BlockSpec((2, B, H), lambda i: (0, 0, 0)),       # h_n
            pl.BlockSpec((2, B, H), lambda i: (0, 0, 0)),       # c_n
        ],
    )

    return pl.pallas_call(
        kernel,
        out_shape=out_shapes,
        grid_spec=grid_spec,
        compiler_params=pltpu.CompilerParams(
            dimension_semantics=("arbitrary",)),
    )(lens2d, xproj_f, xproj_b, whh_f, whh_b)


# ----------------------------------------------------------------------------
# Encoder wrapper (parameter setup + glue in plain JAX). Fully jit-able.
# ----------------------------------------------------------------------------
class PallasEncoder:
    """Bidirectional single-layer LSTM encoder (batch_first=True)."""

    def __init__(self, embedding_dim, hidden_size, key):
        E, H = embedding_dim, hidden_size
        bound = 1.0 / jnp.sqrt(jnp.float32(H))
        ks = jax.random.split(key, 8)
        u = lambda k, shape: jax.random.uniform(k, shape, jnp.float32,
                                                -bound, bound)
        # PyTorch nn.LSTM parameter shapes (per direction):
        #   weight_ih: (4H, E), weight_hh: (4H, H), bias_ih/bias_hh: (4H,)
        # row/column order [i, f, g, o].
        self.w_ih_f, self.w_hh_f = u(ks[0], (4 * H, E)), u(ks[1], (4 * H, H))
        self.b_ih_f, self.b_hh_f = u(ks[2], (4 * H,)), u(ks[3], (4 * H,))
        self.w_ih_b, self.w_hh_b = u(ks[4], (4 * H, E)), u(ks[5], (4 * H, H))
        self.b_ih_b, self.b_hh_b = u(ks[6], (4 * H,)), u(ks[7], (4 * H,))
        self.E, self.H = E, H

        def reorder(w):
            # last-axis gate blocks PyTorch [i, f, g, o] -> kernel [i, f, o, g]
            i, f, g, o = jnp.split(w, 4, axis=-1)
            return jnp.concatenate([i, f, o, g], axis=-1)

        # Stacked, transposed, gate-reordered parameters for the kernel.
        # (On v6e/v7x these would be cast to bf16 for MXU throughput.)
        self.w_ih_s = jnp.stack([reorder(self.w_ih_f.T),
                                 reorder(self.w_ih_b.T)])        # (2, E, 4H)
        self.whh_fT = reorder(self.w_hh_f.T)                     # (H, 4H)
        self.whh_bT = reorder(self.w_hh_b.T)                     # (H, 4H)
        self.bias_s = jnp.stack([reorder(self.b_ih_f + self.b_hh_f),
                                 reorder(self.b_ih_b + self.b_hh_b)]
                                )[:, None, None, :]              # (2,1,1,4H)

    def __call__(self, embedded_inputs, input_lengths, max_length=None):
        # embedded_inputs: (B, T, E) float32 ; input_lengths: (B,) int
        B, T, E = embedded_inputs.shape
        x = embedded_inputs.astype(jnp.float32)
        lens2d = input_lengths.astype(jnp.int32).reshape(B, 1)

        # Hoisted input projection: one batched MXU matmul for ALL timesteps
        # and both directions; also absorbs the (B,T,E)->(T,B,*) transpose,
        # so no separate HBM transpose pass of x is needed.
        x_proj = jnp.einsum('bte,deg->dtbg', x, self.w_ih_s,
                            preferred_element_type=jnp.float32) + self.bias_s
        # x_proj: (2, T, B, 4H)

        unroll = T if T <= 16 else 8   # cap unroll at production T

        out, h_n, c_n = _bidir_lstm(lens2d, x_proj[0], x_proj[1],
                                    self.whh_fT, self.whh_bT, unroll=unroll)

        # out: (T, B, 2H) already [forward | backward]-concatenated.
        # TODO(synk): at production sizes write the batch-major layout
        # directly from the kernel instead of this wrapper transpose.
        outputs = jnp.transpose(out, (1, 0, 2))            # (B, T, 2H)
        # pad_packed_sequence pads to max(input_lengths); we keep the output
        # jit-able by padding to the static T unless a static max_length is
        # supplied (in this script max(input_lengths) == T, so identical).
        if max_length is not None:
            outputs = outputs[:, :max_length]

        return outputs, (h_n, c_n)     # h_n, c_n: (2, B, H) like PyTorch


# ----------------------------------------------------------------------------
# Pure-JAX reference (same packed-LSTM math, original gate order) for check.
# ----------------------------------------------------------------------------
def _ref_direction(x_bt, lens, wih, whh, bias, reverse):
    B, T, E = x_bt.shape
    H = whh.shape[1]
    h = jnp.zeros((B, H), jnp.float32)
    c = jnp.zeros((B, H), jnp.float32)
    outs = [None] * T
    order = range(T - 1, -1, -1) if reverse else range(T)
    for t in order:
        g = x_bt[:, t] @ wih.T + h @ whh.T + bias
        i_g = jax.nn.sigmoid(g[:, :H])
        f_g = jax.nn.sigmoid(g[:, H:2 * H])
        g_g = jnp.tanh(g[:, 2 * H:3 * H])
        o_g = jax.nn.sigmoid(g[:, 3 * H:])
        c_new = f_g * c + i_g * g_g
        h_new = o_g * jnp.tanh(c_new)
        m = (lens > t)[:, None]
        c = jnp.where(m, c_new, c)
        h = jnp.where(m, h_new, h)
        outs[t] = jnp.where(m, h_new, 0.0)
    return jnp.stack(outs, axis=1), h, c


def _ref_encoder(enc, x, lens):
    f_out, h_f, c_f = _ref_direction(x, lens, enc.w_ih_f, enc.w_hh_f,
                                     enc.b_ih_f + enc.b_hh_f, False)
    b_out, h_b, c_b = _ref_direction(x, lens, enc.w_ih_b, enc.w_hh_b,
                                     enc.b_ih_b + enc.b_hh_b, True)
    out = jnp.concatenate([f_out, b_out], axis=-1)
    return out, (jnp.stack([h_f, h_b]), jnp.stack([c_f, c_b]))


if __name__ == "__main__":
    key = jax.random.PRNGKey(0)
    k_param, k_x = jax.random.split(key)

    B, T, E, H = 4, 8, 16, 32
    enc = PallasEncoder(embedding_dim=E, hidden_size=H, key=k_param)

    x = jax.random.normal(k_x, (B, T, E), jnp.float32)
    # pack_padded_sequence (enforce_sorted=True) needs descending lengths;
    # max length == T so the padded output shape matches PyTorch exactly.
    lengths = jnp.array([8, 7, 5, 3], dtype=jnp.int32)

    fwd = jax.jit(enc.__call__)           # wrapper is jit-able (no host sync)
    outputs, (h_n, c_n) = fwd(x, lengths)
    jax.block_until_ready((outputs, h_n, c_n))

    ref_out, (ref_h, ref_c) = _ref_encoder(enc, x, lengths)
    assert outputs.shape == (B, T, 2 * H)
    assert h_n.shape == (2, B, H) and c_n.shape == (2, B, H)
    assert jnp.allclose(outputs, ref_out, atol=1e-5, rtol=1e-5)
    assert jnp.allclose(h_n, ref_h, atol=1e-5, rtol=1e-5)
    assert jnp.allclose(c_n, ref_c, atol=1e-5, rtol=1e-5)

    print("KERNEL_OK")
</pallas_src>

<mosaic_0001>
module attributes {stable_mosaic.version = 11 : i64} {
  func.func @_bidir_lstm_kernel(%arg0: i32, %arg1: memref<4x1xi32, #tpu.memory_space<vmem>>, %arg2: memref<8x4x128xf32, #tpu.memory_space<vmem>>, %arg3: memref<8x4x128xf32, #tpu.memory_space<vmem>>, %arg4: memref<32x128xf32, #tpu.memory_space<vmem>>, %arg5: memref<32x128xf32, #tpu.memory_space<vmem>>, %arg6: memref<8x4x64xf32, #tpu.memory_space<vmem>>, %arg7: memref<2x4x32xf32, #tpu.memory_space<vmem>>, %arg8: memref<2x4x32xf32, #tpu.memory_space<vmem>>) attributes {dimension_semantics = [#tpu.dimension_semantics<arbitrary>], iteration_bounds = array<i64: 1>, scalar_prefetch = 0 : i64, scratch_operands = 0 : i64, tpu.core_type = #tpu.core_type<tc>, window_params = [{pipeline_mode = #tpu.pipeline_mode<synchronous>, transform_indices = @transform_0, window_bounds = array<i64: 4, 1>}, {pipeline_mode = #tpu.pipeline_mode<synchronous>, transform_indices = @transform_1, window_bounds = array<i64: 8, 4, 128>}, {pipeline_mode = #tpu.pipeline_mode<synchronous>, transform_indices = @transform_2, window_bounds = array<i64: 8, 4, 128>}, {pipeline_mode = #tpu.pipeline_mode<synchronous>, transform_indices = @transform_3, window_bounds = array<i64: 32, 128>}, {pipeline_mode = #tpu.pipeline_mode<synchronous>, transform_indices = @transform_4, window_bounds = array<i64: 32, 128>}, {pipeline_mode = #tpu.pipeline_mode<synchronous>, transform_indices = @transform_5, window_bounds = array<i64: 8, 4, 64>}, {pipeline_mode = #tpu.pipeline_mode<synchronous>, transform_indices = @transform_6, window_bounds = array<i64: 2, 4, 32>}, {pipeline_mode = #tpu.pipeline_mode<synchronous>, transform_indices = @transform_7, window_bounds = array<i64: 2, 4, 32>}]} {
    %c0 = arith.constant 0 : index
    %c0_0 = arith.constant 0 : index
    %0 = vector.load %arg1[%c0, %c0_0] : memref<4x1xi32, #tpu.memory_space<vmem>>, vector<4x1xi32>
    %c0_1 = arith.constant 0 : index
    %c0_2 = arith.constant 0 : index
    %1 = vector.load %arg4[%c0_1, %c0_2] : memref<32x128xf32, #tpu.memory_space<vmem>>, vector<32x128xf32>
    %c0_3 = arith.constant 0 : index
    %c0_4 = arith.constant 0 : index
    %2 = vector.load %arg5[%c0_3, %c0_4] : memref<32x128xf32, #tpu.memory_space<vmem>>, vector<32x128xf32>
    %cst = arith.constant 0.000000e+00 : f32
    %3 = vector.broadcast %cst : f32 to vector<4x32xf32>
    %c0_i32 = arith.constant 0 : i32
    %c7_i32 = arith.constant 7 : i32
    %4 = arith.subi %c7_i32, %c0_i32 : i32
    %5 = arith.index_cast %c0_i32 : i32 to index
    %c0_5 = arith.constant 0 : index
    %c0_6 = arith.constant 0 : index
    %6 = vector.load %arg2[%5, %c0_5, %c0_6] : memref<8x4x128xf32, #tpu.memory_space<vmem>>, vector<1x4x128xf32>
    %7 = vector.shape_cast %6 : vector<1x4x128xf32> to vector<4x128xf32>
    %cst_7 = arith.constant dense<0.000000e+00> : vector<4x128xf32>
    %8 = tpu.matmul %3, %1, %cst_7 {dimension_numbers = #tpu.dot_dimension_numbers<[1], [0], [0], [1], [0, 0, 1, 1], [], []>} : vector<4x32xf32>, vector<32x128xf32>, vector<4x128xf32> -> vector<4x128xf32>
    %9 = arith.addf %7, %8 : vector<4x128xf32>
    %10 = vector.extract_strided_slice %9 {offsets = [0, 0], sizes = [4, 96], strides = [1, 1]} : vector<4x128xf32> to vector<4x96xf32>
    %11 = arith.negf %10 : vector<4x96xf32>
    %12 = math.exp %11 : vector<4x96xf32>
    %cst_8 = arith.constant 1.000000e+00 : f32
    %13 = vector.broadcast %cst_8 : f32 to vector<4x96xf32>
    %14 = arith.addf %13, %12 : vector<4x96xf32>
    %15 = arith.divf %13, %14 : vector<4x96xf32>
    %16 = vector.extract_strided_slice %15 {offsets = [0, 0], sizes = [4, 32], strides = [1, 1]} : vector<4x96xf32> to vector<4x32xf32>
    %17 = vector.extract_strided_slice %15 {offsets = [0, 32], sizes = [4, 32], strides = [1, 1]} : vector<4x96xf32> to vector<4x32xf32>
    %18 = vector.extract_strided_slice %15 {offsets = [0, 64], sizes = [4, 32], strides = [1, 1]} : vector<4x96xf32> to vector<4x32xf32>
    %19 = vector.extract_strided_slice %9 {offsets = [0, 96], sizes = [4, 32], strides = [1, 1]} : vector<4x128xf32> to vector<4x32xf32>
    %20 = math.tanh %19 : vector<4x32xf32>
    %21 = arith.mulf %17, %3 : vector<4x32xf32>
    %22 = arith.mulf %16, %20 : vector<4x32xf32>
    %23 = arith.addf %21, %22 : vector<4x32xf32>
    %24 = math.tanh %23 : vector<4x32xf32>
    %25 = arith.mulf %18, %24 : vector<4x32xf32>
    %26 = arith.index_cast %4 : i32 to index
    %c0_9 = arith.constant 0 : index
    %c0_10 = arith.constant 0 : index
    %27 = vector.load %arg3[%26, %c0_9, %c0_10] : memref<8x4x128xf32, #tpu.memory_space<vmem>>, vector<1x4x128xf32>
    %28 = vector.shape_cast %27 : vector<1x4x128xf32> to vector<4x128xf32>
    %cst_11 = arith.constant dense<0.000000e+00> : vector<4x128xf32>
    %29 = tpu.matmul %3, %2, %cst_11 {dimension_numbers = #tpu.dot_dimension_numbers<[1], [0], [0], [1], [0, 0, 1, 1], [], []>} : vector<4x32xf32>, vector<32x128xf32>, vector<4x128xf32> -> vector<4x128xf32>
    %30 = arith.addf %28, %29 : vector<4x128xf32>
    %31 = vector.extract_strided_slice %30 {offsets = [0, 0], sizes = [4, 96], strides = [1, 1]} : vector<4x128xf32> to vector<4x96xf32>
    %32 = arith.negf %31 : vector<4x96xf32>
    %33 = math.exp %32 : vector<4x96xf32>
    %cst_12 = arith.constant 1.000000e+00 : f32
    %34 = vector.broadcast %cst_12 : f32 to vector<4x96xf32>
    %35 = arith.addf %34, %33 : vector<4x96xf32>
    %36 = arith.divf %34, %35 : vector<4x96xf32>
    %37 = vector.extract_strided_slice %36 {offsets = [0, 0], sizes = [4, 32], strides = [1, 1]} : vector<4x96xf32> to vector<4x32xf32>
    %38 = vector.extract_strided_slice %36 {offsets = [0, 32], sizes = [4, 32], strides = [1, 1]} : vector<4x96xf32> to vector<4x32xf32>
    %39 = vector.extract_strided_slice %36 {offsets = [0, 64], sizes = [4, 32], strides = [1, 1]} : vector<4x96xf32> to vector<4x32xf32>
    %40 = vector.extract_strided_slice %30 {offsets = [0, 96], sizes = [4, 32], strides = [1, 1]} : vector<4x128xf32> to vector<4x32xf32>
    %41 = math.tanh %40 : vector<4x32xf32>
    %42 = arith.mulf %38, %3 : vector<4x32xf32>
    %43 = arith.mulf %37, %41 : vector<4x32xf32>
    %44 = arith.addf %42, %43 : vector<4x32xf32>
    %45 = math.tanh %44 : vector<4x32xf32>
    %46 = arith.mulf %39, %45 : vector<4x32xf32>
    %47 = vector.broadcast %c0_i32 : i32 to vector<4x1xi32>
    %48 = arith.cmpi sgt, %0, %47 : vector<4x1xi32>
    %49 = vector.broadcast %4 : i32 to vector<4x1xi32>
    %50 = arith.cmpi sgt, %0, %49 : vector<4x1xi32>
    %51 = vector.shape_cast %48 : vector<4x1xi1> to vector<4x1xi1>
    %52 = vector.broadcast %51 : vector<4x1xi1> to vector<4x32xi1>
    %53 = arith.select %52, %25, %3 : vector<4x32xi1>, vector<4x32xf32>
    %54 = vector.shape_cast %48 : vector<4x1xi1> to vector<4x1xi1>
    %55 = vector.broadcast %54 : vector<4x1xi1> to vector<4x32xi1>
    %56 = arith.select %55, %23, %3 : vector<4x32xi1>, vector<4x32xf32>
    %57 = vector.shape_cast %50 : vector<4x1xi1> to vector<4x1xi1>
    %58 = vector.broadcast %57 : vector<4x1xi1> to vector<4x32xi1>
    %59 = arith.select %58, %46, %3 : vector<4x32xi1>, vector<4x32xf32>
    %60 = vector.shape_cast %50 : vector<4x1xi1> to vector<4x1xi1>
    %61 = vector.broadcast %60 : vector<4x1xi1> to vector<4x32xi1>
    %62 = arith.select %61, %44, %3 : vector<4x32xi1>, vector<4x32xf32>
    %cst_13 = arith.constant 0.000000e+00 : f32
    %63 = vector.shape_cast %48 : vector<4x1xi1> to vector<4x1xi1>
    %64 = vector.broadcast %63 : vector<4x1xi1> to vector<4x32xi1>
    %65 = vector.broadcast %cst_13 : f32 to vector<4x32xf32>
    %66 = arith.select %64, %25, %65 : vector<4x32xi1>, vector<4x32xf32>
    %67 = arith.index_cast %c0_i32 : i32 to index
    %c0_14 = arith.constant 0 : index
    %c0_15 = arith.constant 0 : index
    %68 = vector.load %arg6[%67, %c0_14, %c0_15] : memref<8x4x64xf32, #tpu.memory_space<vmem>>, vector<1x4x32xf32>
    %69 = vector.shape_cast %68 : vector<1x4x32xf32> to vector<4x32xf32>
    %70 = vector.shape_cast %66 : vector<4x32xf32> to vector<1x4x32xf32>
    tpu.vector_store %arg6[%67, %c0_14, %c0_15], %70 {strides = array<i32>} : memref<8x4x64xf32, #tpu.memory_space<vmem>>, vector<1x4x32xf32>,
    %cst_16 = arith.constant 0.000000e+00 : f32
    %71 = vector.shape_cast %50 : vector<4x1xi1> to vector<4x1xi1>
    %72 = vector.broadcast %71 : vector<4x1xi1> to vector<4x32xi1>
    %73 = vector.broadcast %cst_16 : f32 to vector<4x32xf32>
    %74 = arith.select %72, %46, %73 : vector<4x32xi1>, vector<4x32xf32>
    %75 = arith.index_cast %4 : i32 to index
    %c0_17 = arith.constant 0 : index
    %c32 = arith.constant 32 : index
    %76 = vector.load %arg6[%75, %c0_17, %c32] : memref<8x4x64xf32, #tpu.memory_space<vmem>>, vector<1x4x32xf32>
    %77 = vector.shape_cast %76 : vector<1x4x32xf32> to vector<4x32xf32>
    %78 = vector.shape_cast %74 : vector<4x32xf32> to vector<1x4x32xf32>
    tpu.vector_store %arg6[%75, %c0_17, %c32], %78 {strides = array<i32>} : memref<8x4x64xf32, #tpu.memory_space<vmem>>, vector<1x4x32xf32>,
    %c1_i32 = arith.constant 1 : i32
    %c7_i32_18 = arith.constant 7 : i32
    %79 = arith.subi %c7_i32_18, %c1_i32 : i32
    %80 = arith.index_cast %c1_i32 : i32 to index
    %c0_19 = arith.constant 0 : index
    %c0_20 = arith.constant 0 : index
    %81 = vector.load %arg2[%80, %c0_19, %c0_20] : memref<8x4x128xf32, #tpu.memory_space<vmem>>, vector<1x4x128xf32>
    %82 = vector.shape_cast %81 : vector<1x4x128xf32> to vector<4x128xf32>
    %cst_21 = arith.constant dense<0.000000e+00> : vector<4x128xf32>
    %83 = tpu.matmul %53, %1, %cst_21 {dimension_numbers = #tpu.dot_dimension_numbers<[1], [0], [0], [1], [0, 0, 1, 1], [], []>} : vector<4x32xf32>, vector<32x128xf32>, vector<4x128xf32> -> vector<4x128xf32>
    %84 = arith.addf %82, %83 : vector<4x128xf32>
    %85 = vector.extract_strided_slice %84 {offsets = [0, 0], sizes = [4, 96], strides = [1, 1]} : vector<4x128xf32> to vector<4x96xf32>
    %86 = arith.negf %85 : vector<4x96xf32>
    %87 = math.exp %86 : vector<4x96xf32>
    %cst_22 = arith.constant 1.000000e+00 : f32
    %88 = vector.broadcast %cst_22 : f32 to vector<4x96xf32>
    %89 = arith.addf %88, %87 : vector<4x96xf32>
    %90 = arith.divf %88, %89 : vector<4x96xf32>
    %91 = vector.extract_strided_slice %90 {offsets = [0, 0], sizes = [4, 32], strides = [1, 1]} : vector<4x96xf32> to vector<4x32xf32>
    %92 = vector.extract_strided_slice %90 {offsets = [0, 32], sizes = [4, 32], strides = [1, 1]} : vector<4x96xf32> to vector<4x32xf32>
    %93 = vector.extract_strided_slice %90 {offsets = [0, 64], sizes = [4, 32], strides = [1, 1]} : vector<4x96xf32> to vector<4x32xf32>
    %94 = vector.extract_strided_slice %84 {offsets = [0, 96], sizes = [4, 32], strides = [1, 1]} : vector<4x128xf32> to vector<4x32xf32>
    %95 = math.tanh %94 : vector<4x32xf32>
    %96 = arith.mulf %92, %56 : vector<4x32xf32>
    %97 = arith.mulf %91, %95 : vector<4x32xf32>
    %98 = arith.addf %96, %97 : vector<4x32xf32>
    %99 = math.tanh %98 : vector<4x32xf32>
    %100 = arith.mulf %93, %99 : vector<4x32xf32>
    %101 = arith.index_cast %79 : i32 to index
    %c0_23 = arith.constant 0 : index
    %c0_24 = arith.constant 0 : index
    %102 = vector.load %arg3[%101, %c0_23, %c0_24] : memref<8x4x128xf32, #tpu.memory_space<vmem>>, vector<1x4x128xf32>
    %103 = vector.shape_cast %102 : vector<1x4x128xf32> to vector<4x128xf32>
    %cst_25 = arith.constant dense<0.000000e+00> : vector<4x128xf32>
    %104 = tpu.matmul %59, %2, %cst_25 {dimension_numbers = #tpu.dot_dimension_numbers<[1], [0], [0], [1], [0, 0, 1, 1], [], []>} : vector<4x32xf32>, vector<32x128xf32>, vector<4x128xf32> -> vector<4x128xf32>
    %105 = arith.addf %103, %104 : vector<4x128xf32>
    %106 = vector.extract_strided_slice %105 {offsets = [0, 0], sizes = [4, 96], strides = [1, 1]} : vector<4x128xf32> to vector<4x96xf32>
    %107 = arith.negf %106 : vector<4x96xf32>
    %108 = math.exp %107 : vector<4x96xf32>
    %cst_26 = arith.constant 1.000000e+00 : f32
    %109 = vector.broadcast %cst_26 : f32 to vector<4x96xf32>
    %110 = arith.addf %109, %108 : vector<4x96xf32>
    %111 = arith.divf %109, %110 : vector<4x96xf32>
    %112 = vector.extract_strided_slice %111 {offsets = [0, 0], sizes = [4, 32], strides = [1, 1]} : vector<4x96xf32> to vector<4x32xf32>
    %113 = vector.extract_strided_slice %111 {offsets = [0, 32], sizes = [4, 32], strides = [1, 1]} : vector<4x96xf32> to vector<4x32xf32>
    %114 = vector.extract_strided_slice %111 {offsets = [0, 64], sizes = [4, 32], strides = [1, 1]} : vector<4x96xf32> to vector<4x32xf32>
    %115 = vector.extract_strided_slice %105 {offsets = [0, 96], sizes = [4, 32], strides = [1, 1]} : vector<4x128xf32> to vector<4x32xf32>
    %116 = math.tanh %115 : vector<4x32xf32>
    %117 = arith.mulf %113, %62 : vector<4x32xf32>
    %118 = arith.mulf %112, %116 : vector<4x32xf32>
    %119 = arith.addf %117, %118 : vector<4x32xf32>
    %120 = math.tanh %119 : vector<4x32xf32>
    %121 = arith.mulf %114, %120 : vector<4x32xf32>
    %122 = vector.broadcast %c1_i32 : i32 to vector<4x1xi32>
    %123 = arith.cmpi sgt, %0, %122 : vector<4x1xi32>
    %124 = vector.broadcast %79 : i32 to vector<4x1xi32>
    %125 = arith.cmpi sgt, %0, %124 : vector<4x1xi32>
    %126 = vector.shape_cast %123 : vector<4x1xi1> to vector<4x1xi1>
    %127 = vector.broadcast %126 : vector<4x1xi1> to vector<4x32xi1>
    %128 = arith.select %127, %100, %53 : vector<4x32xi1>, vector<4x32xf32>
    %129 = vector.shape_cast %123 : vector<4x1xi1> to vector<4x1xi1>
    %130 = vector.broadcast %129 : vector<4x1xi1> to vector<4x32xi1>
    %131 = arith.select %130, %98, %56 : vector<4x32xi1>, vector<4x32xf32>
    %132 = vector.shape_cast %125 : vector<4x1xi1> to vector<4x1xi1>
    %133 = vector.broadcast %132 : vector<4x1xi1> to vector<4x32xi1>
    %134 = arith.select %133, %121, %59 : vector<4x32xi1>, vector<4x32xf32>
    %135 = vector.shape_cast %125 : vector<4x1xi1> to vector<4x1xi1>
    %136 = vector.broadcast %135 : vector<4x1xi1> to vector<4x32xi1>
    %137 = arith.select %136, %119, %62 : vector<4x32xi1>, vector<4x32xf32>
    %cst_27 = arith.constant 0.000000e+00 : f32
    %138 = vector.shape_cast %123 : vector<4x1xi1> to vector<4x1xi1>
    %139 = vector.broadcast %138 : vector<4x1xi1> to vector<4x32xi1>
    %140 = vector.broadcast %cst_27 : f32 to vector<4x32xf32>
    %141 = arith.select %139, %100, %140 : vector<4x32xi1>, vector<4x32xf32>
    %142 = arith.index_cast %c1_i32 : i32 to index
    %c0_28 = arith.constant 0 : index
    %c0_29 = arith.constant 0 : index
    %143 = vector.load %arg6[%142, %c0_28, %c0_29] : memref<8x4x64xf32, #tpu.memory_space<vmem>>, vector<1x4x32xf32>
    %144 = vector.shape_cast %143 : vector<1x4x32xf32> to vector<4x32xf32>
    %145 = vector.shape_cast %141 : vector<4x32xf32> to vector<1x4x32xf32>
    tpu.vector_store %arg6[%142, %c0_28, %c0_29], %145 {strides = array<i32>} : memref<8x4x64xf32, #tpu.memory_space<vmem>>, vector<1x4x32xf32>,
    %cst_30 = arith.constant 0.000000e+00 : f32
    %146 = vector.shape_cast %125 : vector<4x1xi1> to vector<4x1xi1>
    %147 = vector.broadcast %146 : vector<4x1xi1> to vector<4x32xi1>
    %148 = vector.broadcast %cst_30 : f32 to vector<4x32xf32>
    %149 = arith.select %147, %121, %148 : vector<4x32xi1>, vector<4x32xf32>
    %150 = arith.index_cast %79 : i32 to index
    %c0_31 = arith.constant 0 : index
    %c32_32 = arith.constant 32 : index
    %151 = vector.load %arg6[%150, %c0_31, %c32_32] : memref<8x4x64xf32, #tpu.memory_space<vmem>>, vector<1x4x32xf32>
    %152 = vector.shape_cast %151 : vector<1x4x32xf32> to vector<4x32xf32>
    %153 = vector.shape_cast %149 : vector<4x32xf32> to vector<1x4x32xf32>
    tpu.vector_store %arg6[%150, %c0_31, %c32_32], %153 {strides = array<i32>} : memref<8x4x64xf32, #tpu.memory_space<vmem>>, vector<1x4x32xf32>,
    %c2_i32 = arith.constant 2 : i32
    %c7_i32_33 = arith.constant 7 : i32
    %154 = arith.subi %c7_i32_33, %c2_i32 : i32
    %155 = arith.index_cast %c2_i32 : i32 to index
    %c0_34 = arith.constant 0 : index
    %c0_35 = arith.constant 0 : index
    %156 = vector.load %arg2[%155, %c0_34, %c0_35] : memref<8x4x128xf32, #tpu.memory_space<vmem>>, vector<1x4x128xf32>
    %157 = vector.shape_cast %156 : vector<1x4x128xf32> to vector<4x128xf32>
    %cst_36 = arith.constant dense<0.000000e+00> : vector<4x128xf32>
    %158 = tpu.matmul %128, %1, %cst_36 {dimension_numbers = #tpu.dot_dimension_numbers<[1], [0], [0], [1], [0, 0, 1, 1], [], []>} : vector<4x32xf32>, vector<32x128xf32>, vector<4x128xf32> -> vector<4x128xf32>
    %159 = arith.addf %157, %158 : vector<4x128xf32>
    %160 = vector.extract_strided_slice %159 {offsets = [0, 0], sizes = [4, 96], strides = [1, 1]} : vector<4x128xf32> to vector<4x96xf32>
    %161 = arith.negf %160 : vector<4x96xf32>
    %162 = math.exp %161 : vector<4x96xf32>
    %cst_37 = arith.constant 1.000000e+00 : f32
    %163 = vector.broadcast %cst_37 : f32 to vector<4x96xf32>
    %164 = arith.addf %163, %162 : vector<4x96xf32>
    %165 = arith.divf %163, %164 : vector<4x96xf32>
    %166 = vector.extract_strided_slice %165 {offsets = [0, 0], sizes = [4, 32], strides = [1, 1]} : vector<4x96xf32> to vector<4x32xf32>
    %167 = vector.extract_strided_slice %165 {offsets = [0, 32], sizes = [4, 32], strides = [1, 1]} : vector<4x96xf32> to vector<4x32xf32>
    %168 = vector.extract_strided_slice %165 {offsets = [0, 64], sizes = [4, 32], strides = [1, 1]} : vector<4x96xf32> to vector<4x32xf32>
    %169 = vector.extract_strided_slice %159 {offsets = [0, 96], sizes = [4, 32], strides = [1, 1]} : vector<4x128xf32> to vector<4x32xf32>
    %170 = math.tanh %169 : vector<4x32xf32>
    %171 = arith.mulf %167, %131 : vector<4x32xf32>
    %172 = arith.mulf %166, %170 : vector<4x32xf32>
    %173 = arith.addf %171, %172 : vector<4x32xf32>
    %174 = math.tanh %173 : vector<4x32xf32>
    %175 = arith.mulf %168, %174 : vector<4x32xf32>
    %176 = arith.index_cast %154 : i32 to index
    %c0_38 = arith.constant 0 : index
    %c0_39 = arith.constant 0 : index
    %177 = vector.load %arg3[%176, %c0_38, %c0_39] : memref<8x4x128xf32, #tpu.memory_space<vmem>>, vector<1x4x128xf32>
    %178 = vector.shape_cast %177 : vector<1x4x128xf32> to vector<4x128xf32>
    %cst_40 = arith.constant dense<0.000000e+00> : vector<4x128xf32>
    %179 = tpu.matmul %134, %2, %cst_40 {dimension_numbers = #tpu.dot_dimension_numbers<[1], [0], [0], [1], [0, 0, 1, 1], [], []>} : vector<4x32xf32>, vector<32x128xf32>, vector<4x128xf32> -> vector<4x128xf32>
    %180 = arith.addf %178, %179 : vector<4x128xf32>
    %181 = vector.extract_strided_slice %180 {offsets = [0, 0], sizes = [4, 96], strides = [1, 1]} : vector<4x128xf32> to vector<4x96xf32>
    %182 = arith.negf %181 : vector<4x96xf32>
    %183 = math.exp %182 : vector<4x96xf32>
    %cst_41 = arith.constant 1.000000e+00 : f32
    %184 = vector.broadcast %cst_41 : f32 to vector<4x96xf32>
    %185 = arith.addf %184, %183 : vector<4x96xf32>
    %186 = arith.divf %184, %185 : vector<4x96xf32>
    %187 = vector.extract_strided_slice %186 {offsets = [0, 0], sizes = [4, 32], strides = [1, 1]} : vector<4x96xf32> to vector<4x32xf32>
    %188 = vector.extract_strided_slice %186 {offsets = [0, 32], sizes = [4, 32], strides = [1, 1]} : vector<4x96xf32> to vector<4x32xf32>
    %189 = vector.extract_strided_slice %186 {offsets = [0, 64], sizes = [4, 32], strides = [1, 1]} : vector<4x96xf32> to vector<4x32xf32>
    %190 = vector.extract_strided_slice %180 {offsets = [0, 96], sizes = [4, 32], strides = [1, 1]} : vector<4x128xf32> to vector<4x32xf32>
    %191 = math.tanh %190 : vector<4x32xf32>
    %192 = arith.mulf %188, %137 : vector<4x32xf32>
    %193 = arith.mulf %187, %191 : vector<4x32xf32>
    %194 = arith.addf %192, %193 : vector<4x32xf32>
    %195 = math.tanh %194 : vector<4x32xf32>
    %196 = arith.mulf %189, %195 : vector<4x32xf32>
    %197 = vector.broadcast %c2_i32 : i32 to vector<4x1xi32>
    %198 = arith.cmpi sgt, %0, %197 : vector<4x1xi32>
    %199 = vector.broadcast %154 : i32 to vector<4x1xi32>
    %200 = arith.cmpi sgt, %0, %199 : vector<4x1xi32>
    %201 = vector.shape_cast %198 : vector<4x1xi1> to vector<4x1xi1>
    %202 = vector.broadcast %201 : vector<4x1xi1> to vector<4x32xi1>
    %203 = arith.select %202, %175, %128 : vector<4x32xi1>, vector<4x32xf32>
    %204 = vector.shape_cast %198 : vector<4x1xi1> to vector<4x1xi1>
    %205 = vector.broadcast %204 : vector<4x1xi1> to vector<4x32xi1>
    %206 = arith.select %205, %173, %131 : vector<4x32xi1>, vector<4x32xf32>
    %207 = vector.shape_cast %200 : vector<4x1xi1> to vector<4x1xi1>
    %208 = vector.broadcast %207 : vector<4x1xi1> to vector<4x32xi1>
    %209 = arith.select %208, %196, %134 : vector<4x32xi1>, vector<4x32xf32>
    %210 = vector.shape_cast %200 : vector<4x1xi1> to vector<4x1xi1>
    %211 = vector.broadcast %210 : vector<4x1xi1> to vector<4x32xi1>
    %212 = arith.select %211, %194, %137 : vector<4x32xi1>, vector<4x32xf32>
    %cst_42 = arith.constant 0.000000e+00 : f32
    %213 = vector.shape_cast %198 : vector<4x1xi1> to vector<4x1xi1>
    %214 = vector.broadcast %213 : vector<4x1xi1> to vector<4x32xi1>
    %215 = vector.broadcast %cst_42 : f32 to vector<4x32xf32>
    %216 = arith.select %214, %175, %215 : vector<4x32xi1>, vector<4x32xf32>
    %217 = arith.index_cast %c2_i32 : i32 to index
    %c0_43 = arith.constant 0 : index
    %c0_44 = arith.constant 0 : index
    %218 = vector.load %arg6[%217, %c0_43, %c0_44] : memref<8x4x64xf32, #tpu.memory_space<vmem>>, vector<1x4x32xf32>
    %219 = vector.shape_cast %218 : vector<1x4x32xf32> to vector<4x32xf32>
    %220 = vector.shape_cast %216 : vector<4x32xf32> to vector<1x4x32xf32>
    tpu.vector_store %arg6[%217, %c0_43, %c0_44], %220 {strides = array<i32>} : memref<8x4x64xf32, #tpu.memory_space<vmem>>, vector<1x4x32xf32>,
    %cst_45 = arith.constant 0.000000e+00 : f32
    %221 = vector.shape_cast %200 : vector<4x1xi1> to vector<4x1xi1>
    %222 = vector.broadcast %221 : vector<4x1xi1> to vector<4x32xi1>
    %223 = vector.broadcast %cst_45 : f32 to vector<4x32xf32>
    %224 = arith.select %222, %196, %223 : vector<4x32xi1>, vector<4x32xf32>
    %225 = arith.index_cast %154 : i32 to index
    %c0_46 = arith.constant 0 : index
    %c32_47 = arith.constant 32 : index
    %226 = vector.load %arg6[%225, %c0_46, %c32_47] : memref<8x4x64xf32, #tpu.memory_space<vmem>>, vector<1x4x32xf32>
    %227 = vector.shape_cast %226 : vector<1x4x32xf32> to vector<4x32xf32>
    %228 = vector.shape_cast %224 : vector<4x32xf32> to vector<1x4x32xf32>
    tpu.vector_store %arg6[%225, %c0_46, %c32_47], %228 {strides = array<i32>} : memref<8x4x64xf32, #tpu.memory_space<vmem>>, vector<1x4x32xf32>,
    %c3_i32 = arith.constant 3 : i32
    %c7_i32_48 = arith.constant 7 : i32
    %229 = arith.subi %c7_i32_48, %c3_i32 : i32
    %230 = arith.index_cast %c3_i32 : i32 to index
    %c0_49 = arith.constant 0 : index
    %c0_50 = arith.constant 0 : index
    %231 = vector.load %arg2[%230, %c0_49, %c0_50] : memref<8x4x128xf32, #tpu.memory_space<vmem>>, vector<1x4x128xf32>
    %232 = vector.shape_cast %231 : vector<1x4x128xf32> to vector<4x128xf32>
    %cst_51 = arith.constant dense<0.000000e+00> : vector<4x128xf32>
    %233 = tpu.matmul %203, %1, %cst_51 {dimension_numbers = #tpu.dot_dimension_numbers<[1], [0], [0], [1], [0, 0, 1, 1], [], []>} : vector<4x32xf32>, vector<32x128xf32>, vector<4x128xf32> -> vector<4x128xf32>
    %234 = arith.addf %232, %233 : vector<4x128xf32>
    %235 = vector.extract_strided_slice %234 {offsets = [0, 0], sizes = [4, 96], strides = [1, 1]} : vector<4x128xf32> to vector<4x96xf32>
    %236 = arith.negf %235 : vector<4x96xf32>
    %237 = math.exp %236 : vector<4x96xf32>
    %cst_52 = arith.constant 1.000000e+00 : f32
    %238 = vector.broadcast %cst_52 : f32 to vector<4x96xf32>
    %239 = arith.addf %238, %237 : vector<4x96xf32>
    %240 = arith.divf %238, %239 : vector<4x96xf32>
    %241 = vector.extract_strided_slice %240 {offsets = [0, 0], sizes = [4, 32], strides = [1, 1]} : vector<4x96xf32> to vector<4x32xf32>
    %242 = vector.extract_strided_slice %240 {offsets = [0, 32], sizes = [4, 32], strides = [1, 1]} : vector<4x96xf32> to vector<4x32xf32>
    %243 = vector.extract_strided_slice %240 {offsets = [0, 64], sizes = [4, 32], strides = [1, 1]} : vector<4x96xf32> to vector<4x32xf32>
    %244 = vector.extract_strided_slice %234 {offsets = [0, 96], sizes = [4, 32], strides = [1, 1]} : vector<4x128xf32> to vector<4x32xf32>
    %245 = math.tanh %244 : vector<4x32xf32>
    %246 = arith.mulf %242, %206 : vector<4x32xf32>
    %247 = arith.mulf %241, %245 : vector<4x32xf32>
    %248 = arith.addf %246, %247 : vector<4x32xf32>
    %249 = math.tanh %248 : vector<4x32xf32>
    %250 = arith.mulf %243, %249 : vector<4x32xf32>
    %251 = arith.index_cast %229 : i32 to index
    %c0_53 = arith.constant 0 : index
    %c0_54 = arith.constant 0 : index
    %252 = vector.load %arg3[%251, %c0_53, %c0_54] : memref<8x4x128xf32, #tpu.memory_space<vmem>>, vector<1x4x128xf32>
    %253 = vector.shape_cast %252 : vector<1x4x128xf32> to vector<4x128xf32>
    %cst_55 = arith.constant dense<0.000000e+00> : vector<4x128xf32>
    %254 = tpu.matmul %209, %2, %cst_55 {dimension_numbers = #tpu.dot_dimension_numbers<[1], [0], [0], [1], [0, 0, 1, 1], [], []>} : vector<4x32xf32>, vector<32x128xf32>, vector<4x128xf32> -> vector<4x128xf32>
    %255 = arith.addf %253, %254 : vector<4x128xf32>
    %256 = vector.extract_strided_slice %255 {offsets = [0, 0], sizes = [4, 96], strides = [1, 1]} : vector<4x128xf32> to vector<4x96xf32>
    %257 = arith.negf %256 : vector<4x96xf32>
    %258 = math.exp %257 : vector<4x96xf32>
    %cst_56 = arith.constant 1.000000e+00 : f32
    %259 = vector.broadcast %cst_56 : f32 to vector<4x96xf32>
    %260 = arith.addf %259, %258 : vector<4x96xf32>
    %261 = arith.divf %259, %260 : vector<4x96xf32>
    %262 = vector.extract_strided_slice %261 {offsets = [0, 0], sizes = [4, 32], strides = [1, 1]} : vector<4x96xf32> to vector<4x32xf32>
    %263 = vector.extract_strided_slice %261 {offsets = [0, 32], sizes = [4, 32], strides = [1, 1]} : vector<4x96xf32> to vector<4x32xf32>
    %264 = vector.extract_strided_slice %261 {offsets = [0, 64], sizes = [4, 32], strides = [1, 1]} : vector<4x96xf32> to vector<4x32xf32>
    %265 = vector.extract_strided_slice %255 {offsets = [0, 96], sizes = [4, 32], strides = [1, 1]} : vector<4x128xf32> to vector<4x32xf32>
    %266 = math.tanh %265 : vector<4x32xf32>
    %267 = arith.mulf %263, %212 : vector<4x32xf32>
    %268 = arith.mulf %262, %266 : vector<4x32xf32>
    %269 = arith.addf %267, %268 : vector<4x32xf32>
    %270 = math.tanh %269 : vector<4x32xf32>
    %271 = arith.mulf %264, %270 : vector<4x32xf32>
    %272 = vector.broadcast %c3_i32 : i32 to vector<4x1xi32>
    %273 = arith.cmpi sgt, %0, %272 : vector<4x1xi32>
    %274 = vector.broadcast %229 : i32 to vector<4x1xi32>
    %275 = arith.cmpi sgt, %0, %274 : vector<4x1xi32>
    %276 = vector.shape_cast %273 : vector<4x1xi1> to vector<4x1xi1>
    %277 = vector.broadcast %276 : vector<4x1xi1> to vector<4x32xi1>
    %278 = arith.select %277, %250, %203 : vector<4x32xi1>, vector<4x32xf32>
    %279 = vector.shape_cast %273 : vector<4x1xi1> to vector<4x1xi1>
    %280 = vector.broadcast %279 : vector<4x1xi1> to vector<4x32xi1>
    %281 = arith.select %280, %248, %206 : vector<4x32xi1>, vector<4x32xf32>
    %282 = vector.shape_cast %275 : vector<4x1xi1> to vector<4x1xi1>
    %283 = vector.broadcast %282 : vector<4x1xi1> to vector<4x32xi1>
    %284 = arith.select %283, %271, %209 : vector<4x32xi1>, vector<4x32xf32>
    %285 = vector.shape_cast %275 : vector<4x1xi1> to vector<4x1xi1>
    %286 = vector.broadcast %285 : vector<4x1xi1> to vector<4x32xi1>
    %287 = arith.select %286, %269, %212 : vector<4x32xi1>, vector<4x32xf32>
    %cst_57 = arith.constant 0.000000e+00 : f32
    %288 = vector.shape_cast %273 : vector<4x1xi1> to vector<4x1xi1>
    %289 = vector.broadcast %288 : vector<4x1xi1> to vector<4x32xi1>
    %290 = vector.broadcast %cst_57 : f32 to vector<4x32xf32>
    %291 = arith.select %289, %250, %290 : vector<4x32xi1>, vector<4x32xf32>
    %292 = arith.index_cast %c3_i32 : i32 to index
    %c0_58 = arith.constant 0 : index
    %c0_59 = arith.constant 0 : index
    %293 = vector.load %arg6[%292, %c0_58, %c0_59] : memref<8x4x64xf32, #tpu.memory_space<vmem>>, vector<1x4x32xf32>
    %294 = vector.shape_cast %293 : vector<1x4x32xf32> to vector<4x32xf32>
    %295 = vector.shape_cast %291 : vector<4x32xf32> to vector<1x4x32xf32>
    tpu.vector_store %arg6[%292, %c0_58, %c0_59], %295 {strides = array<i32>} : memref<8x4x64xf32, #tpu.memory_space<vmem>>, vector<1x4x32xf32>,
    %cst_60 = arith.constant 0.000000e+00 : f32
    %296 = vector.shape_cast %275 : vector<4x1xi1> to vector<4x1xi1>
    %297 = vector.broadcast %296 : vector<4x1xi1> to vector<4x32xi1>
    %298 = vector.broadcast %cst_60 : f32 to vector<4x32xf32>
    %299 = arith.select %297, %271, %298 : vector<4x32xi1>, vector<4x32xf32>
    %300 = arith.index_cast %229 : i32 to index
    %c0_61 = arith.constant 0 : index
    %c32_62 = arith.constant 32 : index
    %301 = vector.load %arg6[%300, %c0_61, %c32_62] : memref<8x4x64xf32, #tpu.memory_space<vmem>>, vector<1x4x32xf32>
    %302 = vector.shape_cast %301 : vector<1x4x32xf32> to vector<4x32xf32>
    %303 = vector.shape_cast %299 : vector<4x32xf32> to vector<1x4x32xf32>
    tpu.vector_store %arg6[%300, %c0_61, %c32_62], %303 {strides = array<i32>} : memref<8x4x64xf32, #tpu.memory_space<vmem>>, vector<1x4x32xf32>,
    %c4_i32 = arith.constant 4 : i32
    %c7_i32_63 = arith.constant 7 : i32
    %304 = arith.subi %c7_i32_63, %c4_i32 : i32
    %305 = arith.index_cast %c4_i32 : i32 to index
    %c0_64 = arith.constant 0 : index
    %c0_65 = arith.constant 0 : index
    %306 = vector.load %arg2[%305, %c0_64, %c0_65] : memref<8x4x128xf32, #tpu.memory_space<vmem>>, vector<1x4x128xf32>
    %307 = vector.shape_cast %306 : vector<1x4x128xf32> to vector<4x128xf32>
    %cst_66 = arith.constant dense<0.000000e+00> : vector<4x128xf32>
    %308 = tpu.matmul %278, %1, %cst_66 {dimension_numbers = #tpu.dot_dimension_numbers<[1], [0], [0], [1], [0, 0, 1, 1], [], []>} : vector<4x32xf32>, vector<32x128xf32>, vector<4x128xf32> -> vector<4x128xf32>
    %309 = arith.addf %307, %308 : vector<4x128xf32>
    %310 = vector.extract_strided_slice %309 {offsets = [0, 0], sizes = [4, 96], strides = [1, 1]} : vector<4x128xf32> to vector<4x96xf32>
    %311 = arith.negf %310 : vector<4x96xf32>
    %312 = math.exp %311 : vector<4x96xf32>
    %cst_67 = arith.constant 1.000000e+00 : f32
    %313 = vector.broadcast %cst_67 : f32 to vector<4x96xf32>
    %314 = arith.addf %313, %312 : vector<4x96xf32>
    %315 = arith.divf %313, %314 : vector<4x96xf32>
    %316 = vector.extract_strided_slice %315 {offsets = [0, 0], sizes = [4, 32], strides = [1, 1]} : vector<4x96xf32> to vector<4x32xf32>
    %317 = vector.extract_strided_slice %315 {offsets = [0, 32], sizes = [4, 32], strides = [1, 1]} : vector<4x96xf32> to vector<4x32xf32>
    %318 = vector.extract_strided_slice %315 {offsets = [0, 64], sizes = [4, 32], strides = [1, 1]} : vector<4x96xf32> to vector<4x32xf32>
    %319 = vector.extract_strided_slice %309 {offsets = [0, 96], sizes = [4, 32], strides = [1, 1]} : vector<4x128xf32> to vector<4x32xf32>
    %320 = math.tanh %319 : vector<4x32xf32>
    %321 = arith.mulf %317, %281 : vector<4x32xf32>
    %322 = arith.mulf %316, %320 : vector<4x32xf32>
    %323 = arith.addf %321, %322 : vector<4x32xf32>
    %324 = math.tanh %323 : vector<4x32xf32>
    %325 = arith.mulf %318, %324 : vector<4x32xf32>
    %326 = arith.index_cast %304 : i32 to index
    %c0_68 = arith.constant 0 : index
    %c0_69 = arith.constant 0 : index
    %327 = vector.load %arg3[%326, %c0_68, %c0_69] : memref<8x4x128xf32, #tpu.memory_space<vmem>>, vector<1x4x128xf32>
    %328 = vector.shape_cast %327 : vector<1x4x128xf32> to vector<4x128xf32>
    %cst_70 = arith.constant dense<0.000000e+00> : vector<4x128xf32>
    %329 = tpu.matmul %284, %2, %cst_70 {dimension_numbers = #tpu.dot_dimension_numbers<[1], [0], [0], [1], [0, 0, 1, 1], [], []>} : vector<4x32xf32>, vector<32x128xf32>, vector<4x128xf32> -> vector<4x128xf32>
    %330 = arith.addf %328, %329 : vector<4x128xf32>
    %331 = vector.extract_strided_slice %330 {offsets = [0, 0], sizes = [4, 96], strides = [1, 1]} : vector<4x128xf32> to vector<4x96xf32>
    %332 = arith.negf %331 : vector<4x96xf32>
    %333 = math.exp %332 : vector<4x96xf32>
    %cst_71 = arith.constant 1.000000e+00 : f32
    %334 = vector.broadcast %cst_71 : f32 to vector<4x96xf32>
    %335 = arith.addf %334, %333 : vector<4x96xf32>
    %336 = arith.divf %334, %335 : vector<4x96xf32>
    %337 = vector.extract_strided_slice %336 {offsets = [0, 0], sizes = [4, 32], strides = [1, 1]} : vector<4x96xf32> to vector<4x32xf32>
    %338 = vector.extract_strided_slice %336 {offsets = [0, 32], sizes = [4, 32], strides = [1, 1]} : vector<4x96xf32> to vector<4x32xf32>
    %339 = vector.extract_strided_slice %336 {offsets = [0, 64], sizes = [4, 32], strides = [1, 1]} : vector<4x96xf32> to vector<4x32xf32>
    %340 = vector.extract_strided_slice %330 {offsets = [0, 96], sizes = [4, 32], strides = [1, 1]} : vector<4x128xf32> to vector<4x32xf32>
    %341 = math.tanh %340 : vector<4x32xf32>
    %342 = arith.mulf %338, %287 : vector<4x32xf32>
    %343 = arith.mulf %337, %341 : vector<4x32xf32>
    %344 = arith.addf %342, %343 : vector<4x32xf32>
    %345 = math.tanh %344 : vector<4x32xf32>
    %346 = arith.mulf %339, %345 : vector<4x32xf32>
    %347 = vector.broadcast %c4_i32 : i32 to vector<4x1xi32>
    %348 = arith.cmpi sgt, %0, %347 : vector<4x1xi32>
    %349 = vector.broadcast %304 : i32 to vector<4x1xi32>
    %350 = arith.cmpi sgt, %0, %349 : vector<4x1xi32>
    %351 = vector.shape_cast %348 : vector<4x1xi1> to vector<4x1xi1>
    %352 = vector.broadcast %351 : vector<4x1xi1> to vector<4x32xi1>
    %353 = arith.select %352, %325, %278 : vector<4x32xi1>, vector<4x32xf32>
    %354 = vector.shape_cast %348 : vector<4x1xi1> to vector<4x1xi1>
    %355 = vector.broadcast %354 : vector<4x1xi1> to vector<4x32xi1>
    %356 = arith.select %355, %323, %281 : vector<4x32xi1>, vector<4x32xf32>
    %357 = vector.shape_cast %350 : vector<4x1xi1> to vector<4x1xi1>
    %358 = vector.broadcast %357 : vector<4x1xi1> to vector<4x32xi1>
    %359 = arith.select %358, %346, %284 : vector<4x32xi1>, vector<4x32xf32>
    %360 = vector.shape_cast %350 : vector<4x1xi1> to vector<4x1xi1>
    %361 = vector.broadcast %360 : vector<4x1xi1> to vector<4x32xi1>
    %362 = arith.select %361, %344, %287 : vector<4x32xi1>, vector<4x32xf32>
    %cst_72 = arith.constant 0.000000e+00 : f32
    %363 = vector.shape_cast %348 : vector<4x1xi1> to vector<4x1xi1>
    %364 = vector.broadcast %363 : vector<4x1xi1> to vector<4x32xi1>
    %365 = vector.broadcast %cst_72 : f32 to vector<4x32xf32>
    %366 = arith.select %364, %325, %365 : vector<4x32xi1>, vector<4x32xf32>
    %367 = arith.index_cast %c4_i32 : i32 to index
    %c0_73 = arith.constant 0 : index
    %c0_74 = arith.constant 0 : index
    %368 = vector.load %arg6[%367, %c0_73, %c0_74] : memref<8x4x64xf32, #tpu.memory_space<vmem>>, vector<1x4x32xf32>
    %369 = vector.shape_cast %368 : vector<1x4x32xf32> to vector<4x32xf32>
    %370 = vector.shape_cast %366 : vector<4x32xf32> to vector<1x4x32xf32>
    tpu.vector_store %arg6[%367, %c0_73, %c0_74], %370 {strides = array<i32>} : memref<8x4x64xf32, #tpu.memory_space<vmem>>, vector<1x4x32xf32>,
    %cst_75 = arith.constant 0.000000e+00 : f32
    %371 = vector.shape_cast %350 : vector<4x1xi1> to vector<4x1xi1>
    %372 = vector.broadcast %371 : vector<4x1xi1> to vector<4x32xi1>
    %373 = vector.broadcast %cst_75 : f32 to vector<4x32xf32>
    %374 = arith.select %372, %346, %373 : vector<4x32xi1>, vector<4x32xf32>
    %375 = arith.index_cast %304 : i32 to index
    %c0_76 = arith.constant 0 : index
    %c32_77 = arith.constant 32 : index
    %376 = vector.load %arg6[%375, %c0_76, %c32_77] : memref<8x4x64xf32, #tpu.memory_space<vmem>>, vector<1x4x32xf32>
    %377 = vector.shape_cast %376 : vector<1x4x32xf32> to vector<4x32xf32>
    %378 = vector.shape_cast %374 : vector<4x32xf32> to vector<1x4x32xf32>
    tpu.vector_store %arg6[%375, %c0_76, %c32_77], %378 {strides = array<i32>} : memref<8x4x64xf32, #tpu.memory_space<vmem>>, vector<1x4x32xf32>,
    %c5_i32 = arith.constant 5 : i32
    %c7_i32_78 = arith.constant 7 : i32
    %379 = arith.subi %c7_i32_78, %c5_i32 : i32
    %380 = arith.index_cast %c5_i32 : i32 to index
    %c0_79 = arith.constant 0 : index
    %c0_80 = arith.constant 0 : index
    %381 = vector.load %arg2[%380, %c0_79, %c0_80] : memref<8x4x128xf32, #tpu.memory_space<vmem>>, vector<1x4x128xf32>
    %382 = vector.shape_cast %381 : vector<1x4x128xf32> to vector<4x128xf32>
    %cst_81 = arith.constant dense<0.000000e+00> : vector<4x128xf32>
    %383 = tpu.matmul %353, %1, %cst_81 {dimension_numbers = #tpu.dot_dimension_numbers<[1], [0], [0], [1], [0, 0, 1, 1], [], []>} : vector<4x32xf32>, vector<32x128xf32>, vector<4x128xf32> -> vector<4x128xf32>
    %384 = arith.addf %382, %383 : vector<4x128xf32>
    %385 = vector.extract_strided_slice %384 {offsets = [0, 0], sizes = [4, 96], strides = [1, 1]} : vector<4x128xf32> to vector<4x96xf32>
    %386 = arith.negf %385 : vector<4x96xf32>
    %387 = math.exp %386 : vector<4x96xf32>
    %cst_82 = arith.constant 1.000000e+00 : f32
    %388 = vector.broadcast %cst_82 : f32 to vector<4x96xf32>
    %389 = arith.addf %388, %387 : vector<4x96xf32>
    %390 = arith.divf %388, %389 : vector<4x96xf32>
    %391 = vector.extract_strided_slice %390 {offsets = [0, 0], sizes = [4, 32], strides = [1, 1]} : vector<4x96xf32> to vector<4x32xf32>
    %392 = vector.extract_strided_slice %390 {offsets = [0, 32], sizes = [4, 32], strides = [1, 1]} : vector<4x96xf32> to vector<4x32xf32>
    %393 = vector.extract_strided_slice %390 {offsets = [0, 64], sizes = [4, 32], strides = [1, 1]} : vector<4x96xf32> to vector<4x32xf32>
    %394 = vector.extract_strided_slice %384 {offsets = [0, 96], sizes = [4, 32], strides = [1, 1]} : vector<4x128xf32> to vector<4x32xf32>
    %395 = math.tanh %394 : vector<4x32xf32>
    %396 = arith.mulf %392, %356 : vector<4x32xf32>
    %397 = arith.mulf %391, %395 : vector<4x32xf32>
    %398 = arith.addf %396, %397 : vector<4x32xf32>
    %399 = math.tanh %398 : vector<4x32xf32>
    %400 = arith.mulf %393, %399 : vector<4x32xf32>
    %401 = arith.index_cast %379 : i32 to index
    %c0_83 = arith.constant 0 : index
    %c0_84 = arith.constant 0 : index
    %402 = vector.load %arg3[%401, %c0_83, %c0_84] : memref<8x4x128xf32, #tpu.memory_space<vmem>>, vector<1x4x128xf32>
    %403 = vector.shape_cast %402 : vector<1x4x128xf32> to vector<4x128xf32>
    %cst_85 = arith.constant dense<0.000000e+00> : vector<4x128xf32>
    %404 = tpu.matmul %359, %2, %cst_85 {dimension_numbers = #tpu.dot_dimension_numbers<[1], [0], [0], [1], [0, 0, 1, 1], [], []>} : vector<4x32xf32>, vector<32x128xf32>, vector<4x128xf32> -> vector<4x128xf32>
    %405 = arith.addf %403, %404 : vector<4x128xf32>
    %406 = vector.extract_strided_slice %405 {offsets = [0, 0], sizes = [4, 96], strides = [1, 1]} : vector<4x128xf32> to vector<4x96xf32>
    %407 = arith.negf %406 : vector<4x96xf32>
    %408 = math.exp %407 : vector<4x96xf32>
    %cst_86 = arith.constant 1.000000e+00 : f32
    %409 = vector.broadcast %cst_86 : f32 to vector<4x96xf32>
    %410 = arith.addf %409, %408 : vector<4x96xf32>
    %411 = arith.divf %409, %410 : vector<4x96xf32>
    %412 = vector.extract_strided_slice %411 {offsets = [0, 0], sizes = [4, 32], strides = [1, 1]} : vector<4x96xf32> to vector<4x32xf32>
    %413 = vector.extract_strided_slice %411 {offsets = [0, 32], sizes = [4, 32], strides = [1, 1]} : vector<4x96xf32> to vector<4x32xf32>
    %414 = vector.extract_strided_slice %411 {offsets = [0, 64], sizes = [4, 32], strides = [1, 1]} : vector<4x96xf32> to vector<4x32xf32>
    %415 = vector.extract_strided_slice %405 {offsets = [0, 96], sizes = [4, 32], strides = [1, 1]} : vector<4x128xf32> to vector<4x32xf32>
    %416 = math.tanh %415 : vector<4x32xf32>
    %417 = arith.mulf %413, %362 : vector<4x32xf32>
    %418 = arith.mulf %412, %416 : vector<4x32xf32>
    %419 = arith.addf %417, %418 : vector<4x32xf32>
    %420 = math.tanh %419 : vector<4x32xf32>
    %421 = arith.mulf %414, %420 : vector<4x32xf32>
    %422 = vector.broadcast %c5_i32 : i32 to vector<4x1xi32>
    %423 = arith.cmpi sgt, %0, %422 : vector<4x1xi32>
    %424 = vector.broadcast %379 : i32 to vector<4x1xi32>
    %425 = arith.cmpi sgt, %0, %424 : vector<4x1xi32>
    %426 = vector.shape_cast %423 : vector<4x1xi1> to vector<4x1xi1>
    %427 = vector.broadcast %426 : vector<4x1xi1> to vector<4x32xi1>
    %428 = arith.select %427, %400, %353 : vector<4x32xi1>, vector<4x32xf32>
    %429 = vector.shape_cast %423 : vector<4x1xi1> to vector<4x1xi1>
    %430 = vector.broadcast %429 : vector<4x1xi1> to vector<4x32xi1>
    %431 = arith.select %430, %398, %356 : vector<4x32xi1>, vector<4x32xf32>
    %432 = vector.shape_cast %425 : vector<4x1xi1> to vector<4x1xi1>
    %433 = vector.broadcast %432 : vector<4x1xi1> to vector<4x32xi1>
    %434 = arith.select %433, %421, %359 : vector<4x32xi1>, vector<4x32xf32>
    %435 = vector.shape_cast %425 : vector<4x1xi1> to vector<4x1xi1>
    %436 = vector.broadcast %435 : vector<4x1xi1> to vector<4x32xi1>
    %437 = arith.select %436, %419, %362 : vector<4x32xi1>, vector<4x32xf32>
    %cst_87 = arith.constant 0.000000e+00 : f32
    %438 = vector.shape_cast %423 : vector<4x1xi1> to vector<4x1xi1>
    %439 = vector.broadcast %438 : vector<4x1xi1> to vector<4x32xi1>
    %440 = vector.broadcast %cst_87 : f32 to vector<4x32xf32>
    %441 = arith.select %439, %400, %440 : vector<4x32xi1>, vector<4x32xf32>
    %442 = arith.index_cast %c5_i32 : i32 to index
    %c0_88 = arith.constant 0 : index
    %c0_89 = arith.constant 0 : index
    %443 = vector.load %arg6[%442, %c0_88, %c0_89] : memref<8x4x64xf32, #tpu.memory_space<vmem>>, vector<1x4x32xf32>
    %444 = vector.shape_cast %443 : vector<1x4x32xf32> to vector<4x32xf32>
    %445 = vector.shape_cast %441 : vector<4x32xf32> to vector<1x4x32xf32>
    tpu.vector_store %arg6[%442, %c0_88, %c0_89], %445 {strides = array<i32>} : memref<8x4x64xf32, #tpu.memory_space<vmem>>, vector<1x4x32xf32>,
    %cst_90 = arith.constant 0.000000e+00 : f32
    %446 = vector.shape_cast %425 : vector<4x1xi1> to vector<4x1xi1>
    %447 = vector.broadcast %446 : vector<4x1xi1> to vector<4x32xi1>
    %448 = vector.broadcast %cst_90 : f32 to vector<4x32xf32>
    %449 = arith.select %447, %421, %448 : vector<4x32xi1>, vector<4x32xf32>
    %450 = arith.index_cast %379 : i32 to index
    %c0_91 = arith.constant 0 : index
    %c32_92 = arith.constant 32 : index
    %451 = vector.load %arg6[%450, %c0_91, %c32_92] : memref<8x4x64xf32, #tpu.memory_space<vmem>>, vector<1x4x32xf32>
    %452 = vector.shape_cast %451 : vector<1x4x32xf32> to vector<4x32xf32>
    %453 = vector.shape_cast %449 : vector<4x32xf32> to vector<1x4x32xf32>
    tpu.vector_store %arg6[%450, %c0_91, %c32_92], %453 {strides = array<i32>} : memref<8x4x64xf32, #tpu.memory_space<vmem>>, vector<1x4x32xf32>,
    %c6_i32 = arith.constant 6 : i32
    %c7_i32_93 = arith.constant 7 : i32
    %454 = arith.subi %c7_i32_93, %c6_i32 : i32
    %455 = arith.index_cast %c6_i32 : i32 to index
    %c0_94 = arith.constant 0 : index
    %c0_95 = arith.constant 0 : index
    %456 = vector.load %arg2[%455, %c0_94, %c0_95] : memref<8x4x128xf32, #tpu.memory_space<vmem>>, vector<1x4x128xf32>
    %457 = vector.shape_cast %456 : vector<1x4x128xf32> to vector<4x128xf32>
    %cst_96 = arith.constant dense<0.000000e+00> : vector<4x128xf32>
    %458 = tpu.matmul %428, %1, %cst_96 {dimension_numbers = #tpu.dot_dimension_numbers<[1], [0], [0], [1], [0, 0, 1, 1], [], []>} : vector<4x32xf32>, vector<32x128xf32>, vector<4x128xf32> -> vector<4x128xf32>
    %459 = arith.addf %457, %458 : vector<4x128xf32>
    %460 = vector.extract_strided_slice %459 {offsets = [0, 0], sizes = [4, 96], strides = [1, 1]} : vector<4x128xf32> to vector<4x96xf32>
    %461 = arith.negf %460 : vector<4x96xf32>
    %462 = math.exp %461 : vector<4x96xf32>
    %cst_97 = arith.constant 1.000000e+00 : f32
    %463 = vector.broadcast %cst_97 : f32 to vector<4x96xf32>
    %464 = arith.addf %463, %462 : vector<4x96xf32>
    %465 = arith.divf %463, %464 : vector<4x96xf32>
    %466 = vector.extract_strided_slice %465 {offsets = [0, 0], sizes = [4, 32], strides = [1, 1]} : vector<4x96xf32> to vector<4x32xf32>
    %467 = vector.extract_strided_slice %465 {offsets = [0, 32], sizes = [4, 32], strides = [1, 1]} : vector<4x96xf32> to vector<4x32xf32>
    %468 = vector.extract_strided_slice %465 {offsets = [0, 64], sizes = [4, 32], strides = [1, 1]} : vector<4x96xf32> to vector<4x32xf32>
    %469 = vector.extract_strided_slice %459 {offsets = [0, 96], sizes = [4, 32], strides = [1, 1]} : vector<4x128xf32> to vector<4x32xf32>
    %470 = math.tanh %469 : vector<4x32xf32>
    %471 = arith.mulf %467, %431 : vector<4x32xf32>
    %472 = arith.mulf %466, %470 : vector<4x32xf32>
    %473 = arith.addf %471, %472 : vector<4x32xf32>
    %474 = math.tanh %473 : vector<4x32xf32>
    %475 = arith.mulf %468, %474 : vector<4x32xf32>
    %476 = arith.index_cast %454 : i32 to index
    %c0_98 = arith.constant 0 : index
    %c0_99 = arith.constant 0 : index
    %477 = vector.load %arg3[%476, %c0_98, %c0_99] : memref<8x4x128xf32, #tpu.memory_space<vmem>>, vector<1x4x128xf32>
    %478 = vector.shape_cast %477 : vector<1x4x128xf32> to vector<4x128xf32>
    %cst_100 = arith.constant dense<0.000000e+00> : vector<4x128xf32>
    %479 = tpu.matmul %434, %2, %cst_100 {dimension_numbers = #tpu.dot_dimension_numbers<[1], [0], [0], [1], [0, 0, 1, 1], [], []>} : vector<4x32xf32>, vector<32x128xf32>, vector<4x128xf32> -> vector<4x128xf32>
    %480 = arith.addf %478, %479 : vector<4x128xf32>
    %481 = vector.extract_strided_slice %480 {offsets = [0, 0], sizes = [4, 96], strides = [1, 1]} : vector<4x128xf32> to vector<4x96xf32>
    %482 = arith.negf %481 : vector<4x96xf32>
    %483 = math.exp %482 : vector<4x96xf32>
    %cst_101 = arith.constant 1.000000e+00 : f32
    %484 = vector.broadcast %cst_101 : f32 to vector<4x96xf32>
    %485 = arith.addf %484, %483 : vector<4x96xf32>
    %486 = arith.divf %484, %485 : vector<4x96xf32>
    %487 = vector.extract_strided_slice %486 {offsets = [0, 0], sizes = [4, 32], strides = [1, 1]} : vector<4x96xf32> to vector<4x32xf32>
    %488 = vector.extract_strided_slice %486 {offsets = [0, 32], sizes = [4, 32], strides = [1, 1]} : vector<4x96xf32> to vector<4x32xf32>
    %489 = vector.extract_strided_slice %486 {offsets = [0, 64], sizes = [4, 32], strides = [1, 1]} : vector<4x96xf32> to vector<4x32xf32>
    %490 = vector.extract_strided_slice %480 {offsets = [0, 96], sizes = [4, 32], strides = [1, 1]} : vector<4x128xf32> to vector<4x32xf32>
    %491 = math.tanh %490 : vector<4x32xf32>
    %492 = arith.mulf %488, %437 : vector<4x32xf32>
    %493 = arith.mulf %487, %491 : vector<4x32xf32>
    %494 = arith.addf %492, %493 : vector<4x32xf32>
    %495 = math.tanh %494 : vector<4x32xf32>
    %496 = arith.mulf %489, %495 : vector<4x32xf32>
    %497 = vector.broadcast %c6_i32 : i32 to vector<4x1xi32>
    %498 = arith.cmpi sgt, %0, %497 : vector<4x1xi32>
    %499 = vector.broadcast %454 : i32 to vector<4x1xi32>
    %500 = arith.cmpi sgt, %0, %499 : vector<4x1xi32>
    %501 = vector.shape_cast %498 : vector<4x1xi1> to vector<4x1xi1>
    %502 = vector.broadcast %501 : vector<4x1xi1> to vector<4x32xi1>
    %503 = arith.select %502, %475, %428 : vector<4x32xi1>, vector<4x32xf32>
    %504 = vector.shape_cast %498 : vector<4x1xi1> to vector<4x1xi1>
    %505 = vector.broadcast %504 : vector<4x1xi1> to vector<4x32xi1>
    %506 = arith.select %505, %473, %431 : vector<4x32xi1>, vector<4x32xf32>
    %507 = vector.shape_cast %500 : vector<4x1xi1> to vector<4x1xi1>
    %508 = vector.broadcast %507 : vector<4x1xi1> to vector<4x32xi1>
    %509 = arith.select %508, %496, %434 : vector<4x32xi1>, vector<4x32xf32>
    %510 = vector.shape_cast %500 : vector<4x1xi1> to vector<4x1xi1>
    %511 = vector.broadcast %510 : vector<4x1xi1> to vector<4x32xi1>
    %512 = arith.select %511, %494, %437 : vector<4x32xi1>, vector<4x32xf32>
    %cst_102 = arith.constant 0.000000e+00 : f32
    %513 = vector.shape_cast %498 : vector<4x1xi1> to vector<4x1xi1>
    %514 = vector.broadcast %513 : vector<4x1xi1> to vector<4x32xi1>
    %515 = vector.broadcast %cst_102 : f32 to vector<4x32xf32>
    %516 = arith.select %514, %475, %515 : vector<4x32xi1>, vector<4x32xf32>
    %517 = arith.index_cast %c6_i32 : i32 to index
    %c0_103 = arith.constant 0 : index
    %c0_104 = arith.constant 0 : index
    %518 = vector.load %arg6[%517, %c0_103, %c0_104] : memref<8x4x64xf32, #tpu.memory_space<vmem>>, vector<1x4x32xf32>
    %519 = vector.shape_cast %518 : vector<1x4x32xf32> to vector<4x32xf32>
    %520 = vector.shape_cast %516 : vector<4x32xf32> to vector<1x4x32xf32>
    tpu.vector_store %arg6[%517, %c0_103, %c0_104], %520 {strides = array<i32>} : memref<8x4x64xf32, #tpu.memory_space<vmem>>, vector<1x4x32xf32>,
    %cst_105 = arith.constant 0.000000e+00 : f32
    %521 = vector.shape_cast %500 : vector<4x1xi1> to vector<4x1xi1>
    %522 = vector.broadcast %521 : vector<4x1xi1> to vector<4x32xi1>
    %523 = vector.broadcast %cst_105 : f32 to vector<4x32xf32>
    %524 = arith.select %522, %496, %523 : vector<4x32xi1>, vector<4x32xf32>
    %525 = arith.index_cast %454 : i32 to index
    %c0_106 = arith.constant 0 : index
    %c32_107 = arith.constant 32 : index
    %526 = vector.load %arg6[%525, %c0_106, %c32_107] : memref<8x4x64xf32, #tpu.memory_space<vmem>>, vector<1x4x32xf32>
    %527 = vector.shape_cast %526 : vector<1x4x32xf32> to vector<4x32xf32>
    %528 = vector.shape_cast %524 : vector<4x32xf32> to vector<1x4x32xf32>
    tpu.vector_store %arg6[%525, %c0_106, %c32_107], %528 {strides = array<i32>} : memref<8x4x64xf32, #tpu.memory_space<vmem>>, vector<1x4x32xf32>,
    %c7_i32_108 = arith.constant 7 : i32
    %c7_i32_109 = arith.constant 7 : i32
    %529 = arith.subi %c7_i32_109, %c7_i32_108 : i32
    %530 = arith.index_cast %c7_i32_108 : i32 to index
    %c0_110 = arith.constant 0 : index
    %c0_111 = arith.constant 0 : index
    %531 = vector.load %arg2[%530, %c0_110, %c0_111] : memref<8x4x128xf32, #tpu.memory_space<vmem>>, vector<1x4x128xf32>
    %532 = vector.shape_cast %531 : vector<1x4x128xf32> to vector<4x128xf32>
    %cst_112 = arith.constant dense<0.000000e+00> : vector<4x128xf32>
    %533 = tpu.matmul %503, %1, %cst_112 {dimension_numbers = #tpu.dot_dimension_numbers<[1], [0], [0], [1], [0, 0, 1, 1], [], []>} : vector<4x32xf32>, vector<32x128xf32>, vector<4x128xf32> -> vector<4x128xf32>
    %534 = arith.addf %532, %533 : vector<4x128xf32>
    %535 = vector.extract_strided_slice %534 {offsets = [0, 0], sizes = [4, 96], strides = [1, 1]} : vector<4x128xf32> to vector<4x96xf32>
    %536 = arith.negf %535 : vector<4x96xf32>
    %537 = math.exp %536 : vector<4x96xf32>
    %cst_113 = arith.constant 1.000000e+00 : f32
    %538 = vector.broadcast %cst_113 : f32 to vector<4x96xf32>
    %539 = arith.addf %538, %537 : vector<4x96xf32>
    %540 = arith.divf %538, %539 : vector<4x96xf32>
    %541 = vector.extract_strided_slice %540 {offsets = [0, 0], sizes = [4, 32], strides = [1, 1]} : vector<4x96xf32> to vector<4x32xf32>
    %542 = vector.extract_strided_slice %540 {offsets = [0, 32], sizes = [4, 32], strides = [1, 1]} : vector<4x96xf32> to vector<4x32xf32>
    %543 = vector.extract_strided_slice %540 {offsets = [0, 64], sizes = [4, 32], strides = [1, 1]} : vector<4x96xf32> to vector<4x32xf32>
    %544 = vector.extract_strided_slice %534 {offsets = [0, 96], sizes = [4, 32], strides = [1, 1]} : vector<4x128xf32> to vector<4x32xf32>
    %545 = math.tanh %544 : vector<4x32xf32>
    %546 = arith.mulf %542, %506 : vector<4x32xf32>
    %547 = arith.mulf %541, %545 : vector<4x32xf32>
    %548 = arith.addf %546, %547 : vector<4x32xf32>
    %549 = math.tanh %548 : vector<4x32xf32>
    %550 = arith.mulf %543, %549 : vector<4x32xf32>
    %551 = arith.index_cast %529 : i32 to index
    %c0_114 = arith.constant 0 : index
    %c0_115 = arith.constant 0 : index
    %552 = vector.load %arg3[%551, %c0_114, %c0_115] : memref<8x4x128xf32, #tpu.memory_space<vmem>>, vector<1x4x128xf32>
    %553 = vector.shape_cast %552 : vector<1x4x128xf32> to vector<4x128xf32>
    %cst_116 = arith.constant dense<0.000000e+00> : vector<4x128xf32>
    %554 = tpu.matmul %509, %2, %cst_116 {dimension_numbers = #tpu.dot_dimension_numbers<[1], [0], [0], [1], [0, 0, 1, 1], [], []>} : vector<4x32xf32>, vector<32x128xf32>, vector<4x128xf32> -> vector<4x128xf32>
    %555 = arith.addf %553, %554 : vector<4x128xf32>
    %556 = vector.extract_strided_slice %555 {offsets = [0, 0], sizes = [4, 96], strides = [1, 1]} : vector<4x128xf32> to vector<4x96xf32>
    %557 = arith.negf %556 : vector<4x96xf32>
    %558 = math.exp %557 : vector<4x96xf32>
    %cst_117 = arith.constant 1.000000e+00 : f32
    %559 = vector.broadcast %cst_117 : f32 to vector<4x96xf32>
    %560 = arith.addf %559, %558 : vector<4x96xf32>
    %561 = arith.divf %559, %560 : vector<4x96xf32>
    %562 = vector.extract_strided_slice %561 {offsets = [0, 0], sizes = [4, 32], strides = [1, 1]} : vector<4x96xf32> to vector<4x32xf32>
    %563 = vector.extract_strided_slice %561 {offsets = [0, 32], sizes = [4, 32], strides = [1, 1]} : vector<4x96xf32> to vector<4x32xf32>
    %564 = vector.extract_strided_slice %561 {offsets = [0, 64], sizes = [4, 32], strides = [1, 1]} : vector<4x96xf32> to vector<4x32xf32>
    %565 = vector.extract_strided_slice %555 {offsets = [0, 96], sizes = [4, 32], strides = [1, 1]} : vector<4x128xf32> to vector<4x32xf32>
    %566 = math.tanh %565 : vector<4x32xf32>
    %567 = arith.mulf %563, %512 : vector<4x32xf32>
    %568 = arith.mulf %562, %566 : vector<4x32xf32>
    %569 = arith.addf %567, %568 : vector<4x32xf32>
    %570 = math.tanh %569 : vector<4x32xf32>
    %571 = arith.mulf %564, %570 : vector<4x32xf32>
    %572 = vector.broadcast %c7_i32_108 : i32 to vector<4x1xi32>
    %573 = arith.cmpi sgt, %0, %572 : vector<4x1xi32>
    %574 = vector.broadcast %529 : i32 to vector<4x1xi32>
    %575 = arith.cmpi sgt, %0, %574 : vector<4x1xi32>
    %576 = vector.shape_cast %573 : vector<4x1xi1> to vector<4x1xi1>
    %577 = vector.broadcast %576 : vector<4x1xi1> to vector<4x32xi1>
    %578 = arith.select %577, %550, %503 : vector<4x32xi1>, vector<4x32xf32>
    %579 = vector.shape_cast %573 : vector<4x1xi1> to vector<4x1xi1>
    %580 = vector.broadcast %579 : vector<4x1xi1> to vector<4x32xi1>
    %581 = arith.select %580, %548, %506 : vector<4x32xi1>, vector<4x32xf32>
    %582 = vector.shape_cast %575 : vector<4x1xi1> to vector<4x1xi1>
    %583 = vector.broadcast %582 : vector<4x1xi1> to vector<4x32xi1>
    %584 = arith.select %583, %571, %509 : vector<4x32xi1>, vector<4x32xf32>
    %585 = vector.shape_cast %575 : vector<4x1xi1> to vector<4x1xi1>
    %586 = vector.broadcast %585 : vector<4x1xi1> to vector<4x32xi1>
    %587 = arith.select %586, %569, %512 : vector<4x32xi1>, vector<4x32xf32>
    %cst_118 = arith.constant 0.000000e+00 : f32
    %588 = vector.shape_cast %573 : vector<4x1xi1> to vector<4x1xi1>
    %589 = vector.broadcast %588 : vector<4x1xi1> to vector<4x32xi1>
    %590 = vector.broadcast %cst_118 : f32 to vector<4x32xf32>
    %591 = arith.select %589, %550, %590 : vector<4x32xi1>, vector<4x32xf32>
    %592 = arith.index_cast %c7_i32_108 : i32 to index
    %c0_119 = arith.constant 0 : index
    %c0_120 = arith.constant 0 : index
    %593 = vector.load %arg6[%592, %c0_119, %c0_120] : memref<8x4x64xf32, #tpu.memory_space<vmem>>, vector<1x4x32xf32>
    %594 = vector.shape_cast %593 : vector<1x4x32xf32> to vector<4x32xf32>
    %595 = vector.shape_cast %591 : vector<4x32xf32> to vector<1x4x32xf32>
    tpu.vector_store %arg6[%592, %c0_119, %c0_120], %595 {strides = array<i32>} : memref<8x4x64xf32, #tpu.memory_space<vmem>>, vector<1x4x32xf32>,
    %cst_121 = arith.constant 0.000000e+00 : f32
    %596 = vector.shape_cast %575 : vector<4x1xi1> to vector<4x1xi1>
    %597 = vector.broadcast %596 : vector<4x1xi1> to vector<4x32xi1>
    %598 = vector.broadcast %cst_121 : f32 to vector<4x32xf32>
    %599 = arith.select %597, %571, %598 : vector<4x32xi1>, vector<4x32xf32>
    %600 = arith.index_cast %529 : i32 to index
    %c0_122 = arith.constant 0 : index
    %c32_123 = arith.constant 32 : index
    %601 = vector.load %arg6[%600, %c0_122, %c32_123] : memref<8x4x64xf32, #tpu.memory_space<vmem>>, vector<1x4x32xf32>
    %602 = vector.shape_cast %601 : vector<1x4x32xf32> to vector<4x32xf32>
    %603 = vector.shape_cast %599 : vector<4x32xf32> to vector<1x4x32xf32>
    tpu.vector_store %arg6[%600, %c0_122, %c32_123], %603 {strides = array<i32>} : memref<8x4x64xf32, #tpu.memory_space<vmem>>, vector<1x4x32xf32>,
    %c8_i32 = arith.constant 8 : i32
    %c0_124 = arith.constant 0 : index
    %c0_125 = arith.constant 0 : index
    %c0_126 = arith.constant 0 : index
    %604 = vector.load %arg7[%c0_124, %c0_125, %c0_126] : memref<2x4x32xf32, #tpu.memory_space<vmem>>, vector<1x4x32xf32>
    %605 = vector.shape_cast %604 : vector<1x4x32xf32> to vector<4x32xf32>
    %606 = vector.shape_cast %578 : vector<4x32xf32> to vector<1x4x32xf32>
    tpu.vector_store %arg7[%c0_124, %c0_125, %c0_126], %606 {strides = array<i32>} : memref<2x4x32xf32, #tpu.memory_space<vmem>>, vector<1x4x32xf32>,
    %c1 = arith.constant 1 : index
    %c0_127 = arith.constant 0 : index
    %c0_128 = arith.constant 0 : index
    %607 = vector.load %arg7[%c1, %c0_127, %c0_128] : memref<2x4x32xf32, #tpu.memory_space<vmem>>, vector<1x4x32xf32>
    %608 = vector.shape_cast %607 : vector<1x4x32xf32> to vector<4x32xf32>
    %609 = vector.shape_cast %584 : vector<4x32xf32> to vector<1x4x32xf32>
    tpu.vector_store %arg7[%c1, %c0_127, %c0_128], %609 {strides = array<i32>} : memref<2x4x32xf32, #tpu.memory_space<vmem>>, vector<1x4x32xf32>,
    %c0_129 = arith.constant 0 : index
    %c0_130 = arith.constant 0 : index
    %c0_131 = arith.constant 0 : index
    %610 = vector.load %arg8[%c0_129, %c0_130, %c0_131] : memref<2x4x32xf32, #tpu.memory_space<vmem>>, vector<1x4x32xf32>
    %611 = vector.shape_cast %610 : vector<1x4x32xf32> to vector<4x32xf32>
    %612 = vector.shape_cast %581 : vector<4x32xf32> to vector<1x4x32xf32>
    tpu.vector_store %arg8[%c0_129, %c0_130, %c0_131], %612 {strides = array<i32>} : memref<2x4x32xf32, #tpu.memory_space<vmem>>, vector<1x4x32xf32>,
    %c1_132 = arith.constant 1 : index
    %c0_133 = arith.constant 0 : index
    %c0_134 = arith.constant 0 : index
    %613 = vector.load %arg8[%c1_132, %c0_133, %c0_134] : memref<2x4x32xf32, #tpu.memory_space<vmem>>, vector<1x4x32xf32>
    %614 = vector.shape_cast %613 : vector<1x4x32xf32> to vector<4x32xf32>
    %615 = vector.shape_cast %587 : vector<4x32xf32> to vector<1x4x32xf32>
    tpu.vector_store %arg8[%c1_132, %c0_133, %c0_134], %615 {strides = array<i32>} : memref<2x4x32xf32, #tpu.memory_space<vmem>>, vector<1x4x32xf32>,
    return
  }
  func.func @transform_0(%arg0: i32) -> (i32, i32) {
    %c0_i32 = arith.constant 0 : i32
    %c0_i32_0 = arith.constant 0 : i32
    %c0_i32_1 = arith.constant 0 : i32
    return %c0_i32, %c0_i32_0 : i32, i32
  }
  func.func @transform_1(%arg0: i32) -> (i32, i32, i32) {
    %c0_i32 = arith.constant 0 : i32
    %c0_i32_0 = arith.constant 0 : i32
    %c0_i32_1 = arith.constant 0 : i32
    %c0_i32_2 = arith.constant 0 : i32
    return %c0_i32, %c0_i32_0, %c0_i32_1 : i32, i32, i32
  }
  func.func @transform_2(%arg0: i32) -> (i32, i32, i32) {
    %c0_i32 = arith.constant 0 : i32
    %c0_i32_0 = arith.constant 0 : i32
    %c0_i32_1 = arith.constant 0 : i32
    %c0_i32_2 = arith.constant 0 : i32
    return %c0_i32, %c0_i32_0, %c0_i32_1 : i32, i32, i32
  }
  func.func @transform_3(%arg0: i32) -> (i32, i32) {
    %c0_i32 = arith.constant 0 : i32
    %c0_i32_0 = arith.constant 0 : i32
    %c0_i32_1 = arith.constant 0 : i32
    return %c0_i32, %c0_i32_0 : i32, i32
  }
  func.func @transform_4(%arg0: i32) -> (i32, i32) {
    %c0_i32 = arith.constant 0 : i32
    %c0_i32_0 = arith.constant 0 : i32
    %c0_i32_1 = arith.constant 0 : i32
    return %c0_i32, %c0_i32_0 : i32, i32
  }
  func.func @transform_5(%arg0: i32) -> (i32, i32, i32) {
    %c0_i32 = arith.constant 0 : i32
    %c0_i32_0 = arith.constant 0 : i32
    %c0_i32_1 = arith.constant 0 : i32
    %c0_i32_2 = arith.constant 0 : i32
    return %c0_i32, %c0_i32_0, %c0_i32_1 : i32, i32, i32
  }
  func.func @transform_6(%arg0: i32) -> (i32, i32, i32) {
    %c0_i32 = arith.constant 0 : i32
    %c0_i32_0 = arith.constant 0 : i32
    %c0_i32_1 = arith.constant 0 : i32
    %c0_i32_2 = arith.constant 0 : i32
    return %c0_i32, %c0_i32_0, %c0_i32_1 : i32, i32, i32
  }
  func.func @transform_7(%arg0: i32) -> (i32, i32, i32) {
    %c0_i32 = arith.constant 0 : i32
    %c0_i32_0 = arith.constant 0 : i32
    %c0_i32_1 = arith.constant 0 : i32
    %c0_i32_2 = arith.constant 0 : i32
    return %c0_i32, %c0_i32_0, %c0_i32_1 : i32, i32, i32
  }
}

</mosaic_0001>

<bundles_post_ra>
// kernel: a_call__.1
= control target key start
LH: loop header
LB: loop body
LE: loop exit
PB: predicated region body
PF: predicated region fallthrough
CT: control target
= control target key end

     0   :  { %13 = vsyncpa [#allocation3], 0  ;;  %v2493_v3 = vmov 0.0|0.0   ;;  %vm2494_vm0 = vmmov 0   ;;  %v2495_v9 = vmov 0.0   ;;  %s3246_s0 = inlined_call_operand.vmem [shape: s32[4,1], index: 0, kind: input, shape index: {}]   ;;  %s3247_s1 = inlined_call_operand.vmem [shape: f32[8,4,128], index: 1, kind: input, shape index: {}]   ;;  %s3248_s2 = inlined_call_operand.vmem [shape: f32[8,4,128], index: 2, kind: input, shape index: {}]   ;;  %s3249_s3 = inlined_call_operand.vmem [shape: f32[32,128], index: 3, kind: input, shape index: {}]   ;;  %s3250_s4 = inlined_call_operand.vmem [shape: f32[32,128], index: 4, kind: input, shape index: {}]   ;;  %s3251_s5 = inlined_call_operand.vmem [shape: f32[8,4,64], index: 5, kind: output, shape index: {0}]   ;;  %s3252_s6 = inlined_call_operand.hbm [shape: f32[2,4,32], index: 6, kind: output, shape index: {1}]   ;;  %s3253_s7 = inlined_call_operand.hbm [shape: f32[2,4,32], index: 7, kind: output, shape index: {2}]  }
   0x1   :  { %v26_v0 = vld [vmem:[%s3249_s3] sm:$0xff]  ;;  %v27_v1 = vld [vmem:[%s3249_s3 + $0x8] sm:$0xff]  ;;  %2209 = vmatprep.subr.bf16.mxu0 %v2493_v3  ;;  %2215 = vmatprep.subr.bf16.mxu1 %v2493_v3  ;;  %v28_v6 = vld [vmem:[%s3249_s3 + $0x10] sm:$0xff] }
   0x2   :  { %v30_v2 = vld [vmem:[%s3250_s4] sm:$0xff]  ;;  %v2553_v4 = vpack.c.bf16 %v27_v1, %v26_v0  ;;  %v31_v5 = vld [vmem:[%s3250_s4 + $0x8] sm:$0xff]  ;;  %v29_v7 = vld [vmem:[%s3249_s3 + $0x18] sm:$0xff]  ;;  %2041 = vmatprep.mubr.msk.f32.mxu0 %vm2494_vm0, %v2495_v9  ;;  %2052 = vmatprep.mubr.msk.f32.mxu1 %vm2494_vm0, %v2495_v9 }
   0x3   :  { %v2565_v8 = vpack.c.bf16 %v31_v5, %v30_v2  ;;  %v32_v10 = vld [vmem:[%s3250_s4 + $0x10] sm:$0xff]  ;;  %v33_v11 = vld [vmem:[%s3250_s4 + $0x18] sm:$0xff]  ;;  %v2578_v12 = vpack.c.bf16 %v29_v7, %v28_v6 }
   0x4   :  { %2211 = vmatpush3.bf16.msra.mxu0 %v2553_v4 }
   0x5   :  { %14 = vsyncpa [#allocation5], 0  ;;  %2212 = vmatprep.subr.bf16.mxu0 %v2493_v3  ;;  %2217 = vmatpush3.bf16.msra.mxu1 %v2565_v8  ;;  %v2582_v13 = vpack.c.bf16 %v33_v11, %v32_v10  ;;  %v2496_v14 = vmov 0   ;;  %v34_v15 = vld [vmem:[%s3247_s1] sm:$0xf]  ;;  %s2497_s21 = smov 32  }
   0x6   :  { %2218 = vmatprep.subr.bf16.mxu1 %v2493_v3  ;;  %2315 = vset.pattern.permute.xlu0 %v2496_v14  ;;  %v1896_v16 = vld [vmem:[%s3248_s2 + $0x1c] sm:$0xf]  ;;  %v2614_v24 = vld [vmem:[%s3246_s0] sm:$0xf]  ;;  %s2498_s0 = smov 64   ;;  %vm251_vm5 = vcmask 257024  }
   0x7   :  { %2316 = vset.pattern.permute.xlu1 %v2496_v14  ;;  %vm231_vm1 = vcmp.gt.s32.totalorder %v2614_v24, 0  ;;  %vm232_vm2 = vcmp.gt.s32.totalorder %v2614_v24, 7  ;;  %vm35_vm6 = vcmask 261120   ;;  %v1899_v58 = vld [vmem:[%s3247_s1 + $0x4] sm:$0xf]  ;;  %vm460_vm7 = vcmp.gt.s32.totalorder %v2614_v24, 1 }
   0x8   :  { %2214 = vmatpush3.bf16.msra.mxu0 %v2578_v12  ;;  %v233_v26 = vsel %vm231_vm1, 1, %v2496_v14  ;;  %v240_v39 = vsel %vm232_vm2, 1, %v2496_v14  ;;  %v1902_v62 = vld [vmem:[%s3248_s2 + $0x18] sm:$0xf]  ;;  %vm461_vm8 = vcmp.gt.s32.totalorder %v2614_v24, 6  ;;  %vm694_vm11 = vcmp.gt.s32.totalorder %v2614_v24, 2 }
   0x9   :  { %2220 = vmatpush3.bf16.msra.mxu1 %v2582_v13  ;;  %2221 = vmatprep.subr.bf16.mxu0 %v2493_v3  ;;  %vm695_vm12 = vcmp.gt.s32.totalorder %v2614_v24, 5  ;;  %vm928_vm15 = vcmp.gt.s32.totalorder %v2614_v24, 3  ;;  %vm929_vm1 = vcmp.gt.s32.totalorder %v2614_v24, 4  ;;  %s2500_s13 = smov [#allocation4]  }
   0xa   :  { %2227 = vmatprep.subr.bf16.mxu1 %v2493_v3  ;;  %s1878_s14 = sshll.u32 %s2500_s13, 4  ;;  %s1879_s14 = int_to_ptr.vmem [resolvable:$true] %s1878_s14 }
   0xb   :  { %2042 = vmatmul.mubr.f32.vlgmr.msra.gmra.mrb[0].mxu0 %v2495_v9  ;;  %s2445_s17 = scalar_lea.vmem %s1879_s14, 128  ;;  %p2450_p1 = scmp.lt.s32.totalorder %s1879_s14, %s1879_s14 }
   0xc   :  { %2053 = vmatmul.mubr.f32.vlgmr.msra.gmra.mrb[0].mxu1 %v2495_v9  ;;  %2223 = vmatpush3.bf16.msra.mxu0 %v2553_v4  ;;  %p2446_p0 = scmp.ne.s32.totalorder %s1879_s14, %s2445_s17  ;;  %p2451_p2 = scmp.lt.s32.totalorder %s2445_s17, %s2445_s17 }
   0xd   :  { %2224 = vmatprep.subr.bf16.mxu0 %v2493_v3  ;;  %2229 = vmatpush3.bf16.msra.mxu1 %v2565_v8 }
   0xe   :  { %2063 = vmatprep.mubr.msk.f32.mxu0 %vm2494_vm0, %v2495_v9  ;;  %2230 = vmatprep.subr.bf16.mxu1 %v2493_v3  ;;  %p2452_p3 = por %p2451_p2, %p2450_p1 }
   0xf   :  { %2074 = vmatprep.mubr.msk.f32.mxu1 %vm2494_vm0, %v2495_v9 }
  0x10   :  { %2226 = vmatpush3.bf16.msra.mxu0 %v2578_v12  ;;  %p2453_p4 = pnand %p2452_p3, %p2446_p0 }
  0x11   :  { %2232 = vmatpush3.bf16.msra.mxu1 %v2582_v13  ;;  %2233 = vmatprep.subr.bf16.mxu0 %v2493_v3 }
  0x12   :  { %2239 = vmatprep.subr.bf16.mxu1 %v2493_v3 }
  0xde   :  { %v105_v17 = vpop.f32.mrb[0].mxu0 }
  0xdf   :  { %v109_v18 = vadd.f32 %v105_v17, %v34_v15  ;;  %v2043_v19 = vpop.f32.mrb[1].mxu0  ;;  %v202_v20 = vpop.f32.mrb[0].mxu1 }
  0xe0   :  { %v206_v21 = vadd.f32 %v1896_v16, %v202_v20  ;;  %v2054_v22 = vpop.f32.mrb[1].mxu1 }
  0xe1   :  { %2317 = vtanh.f32 %v109_v18  ;;  %v1895_v27 = vmul.f32 -1.442695, %v109_v18  ;;  %v462_v22 = vsel %vm460_vm7, 1, %v2496_v14 }
  0xe2   :  { %2319 = vtanh.f32 %v206_v21  ;;  %v1897_v28 = vmul.f32 -1.442695, %v206_v21 }
  0xe3   :  { %2321 = vpow2.f32 %v1895_v27 }
  0xe4   :  { %2323 = vpow2.f32 %v1897_v28 }
  0xeb   :  { %v2318_v23 = vpop.eup %2317 }
  0xec   :  { %119 = vrot.lane.b32.xlu0 %v2318_v23, %s2497_s21  ;;  %v2320_v25 = vpop.eup %2319 }
  0xed   :  { %v2322_v29 = vpop.eup %2321 }
  0xee   :  { %v113_v30 = vadd.f32 1.0, %v2322_v29  ;;  %v2324_v31 = vpop.eup %2323 }
  0xef   :  { %v210_v32 = vadd.f32 1.0, %v2324_v31 }
  0xf0   :  { %216 = vrot.lane.b32.xlu0 %v2320_v25, %s2497_s21  ;;  %2325 = vrcp.f32 %v113_v30  ;;  %v469_v25 = vsel %vm461_vm8, 1, %v2496_v14 }
  0xf1   :  { %2327 = vrcp.f32 %v210_v32 }
  0xf4   :  { %235 = vperm.xlu0 %2315, %v233_v26  }
  0xfa   :  { %v2326_v33 = vpop.eup %2325 }
  0xfb   :  { %v2328_v36 = vpop.eup %2327  ;;  %v117_v40 = vmul.f32 0.0, %v2326_v33 }
  0xfc   :  { %v214_v43 = vmul.f32 0.0, %v2328_v36 }
 0x15e   :  { %v120_v34 = vpop.permute.xlu0 %119 }
 0x15f   :  { %v122_v35 = vmul.f32 %v2326_v33, %v120_v34 }
 0x161   :  { %124 = vrot.lane.b32.xlu1 %v122_v35, %s2497_s21 }
 0x162   :  { %v217_v37 = vpop.permute.xlu0 %216 }
 0x163   :  { %v219_v38 = vmul.f32 %v2328_v36, %v217_v37 }
 0x165   :  { %221 = vrot.lane.b32.xlu1 %v219_v38, %s2497_s21 }
 0x169   :  { %242 = vperm.xlu1 %2316, %v240_v39  }
 0x173   :  { %v2634_v49 = vpop.permute.xlu0 %235 }
 0x174   :  { %vm237_vm3 = vcmp.eq.s32.totalorder %v2634_v49, 1 }
 0x1d3   :  { %v125_v41 = vpop.permute.xlu1 %124 }
 0x1d4   :  { %v2624_v42 = vadd.f32 %v125_v41, %v117_v40 }
 0x1d6   :  { %2329 = vtanh.f32 %v2624_v42  ;;  %v2685_v26 = vsel %vm237_vm3, %v2624_v42, 0.0 }
 0x1d7   :  { %v222_v44 = vpop.permute.xlu1 %221 }
 0x1d8   :  { %v2627_v45 = vadd.f32 %v222_v44, %v214_v43 }
 0x1da   :  { %2331 = vtanh.f32 %v2627_v45 }
 0x1e0   :  { %v2330_v46 = vpop.eup %2329 }
 0x1e1   :  { %130 = vrot.lane.b32.xlu1 %v2330_v46, %s2497_s21  ;;  %v1907_v46 = vld [vmem:[%s3247_s1 + $0x8] sm:$0xf] }
 0x1e4   :  { %v2332_v47 = vpop.eup %2331 }
 0x1e5   :  { %227 = vrot.lane.b32.xlu0 %v2332_v47, %s2497_s21 }
 0x1e8   :  { %v2632_v48 = vpop.permute.xlu1 %242 }
 0x1e9   :  { %vm244_vm4 = vcmp.eq.s32.totalorder %v2632_v48, 1 }
 0x1ea   :  { %v2693_v30 = vsel %vm244_vm4, %v2627_v45, 0.0 }
 0x253   :  { %v131_v50 = vpop.permute.xlu1 %130 }
 0x254   :  { %v133_v51 = vmul.f32 %v2326_v33, %v131_v50 }
 0x256   :  { %v2639_v52 = vsel %vm237_vm3, %v133_v51, 0.0 }
 0x257   :  { %248 = vrot.lane.b32.xlu1 %v2639_v52, %s2498_s0  ;;  %v228_v53 = vpop.permute.xlu0 %227 }
 0x258   :  { %v230_v54 = vmul.f32 %v2328_v36, %v228_v53 }
 0x25a   :  { %v2646_v55 = vsel %vm244_vm4, %v230_v54, 0.0 }
 0x25b   :  { %361 = vrot.lane.b32.xlu0 %v2646_v55, %s2498_s0 }
 0x2c9   :  { %v249_v56 = vpop.permute.xlu1 %248 }
 0x2ca   :  { %252 = vst.msk [vmem:[%s3251_s5] sm:$0xf] %vm251_vm5, %v249_v56  ;;  %2064 = vmatmul.mubr.msk.f32.vlgmr.msra.gmra.mrb[2].mxu0 %vm35_vm6, %v249_v56 }
 0x2cb   :  { %2235 = vmatpush3.bf16.msra.mxu0 %v2553_v4  ;;  %2085 = vmatprep.mubr.msk.f32.mxu0 %vm2494_vm0, %v2495_v9 }
 0x2cc   :  { %2236 = vmatprep.subr.bf16.mxu0 %v2493_v3 }
 0x2cd   :  { %v362_v57 = vpop.permute.xlu0 %361 }
 0x2ce   :  { %2075 = vmatmul.mubr.msk.f32.vlgmr.msra.gmra.mrb[2].mxu1 %vm35_vm6, %v362_v57 }
 0x2cf   :  { %2238 = vmatpush3.bf16.msra.mxu0 %v2578_v12  ;;  %2241 = vmatpush3.bf16.msra.mxu1 %v2565_v8 }
 0x2d0   :  { %2242 = vmatprep.subr.bf16.mxu1 %v2493_v3  ;;  %2096 = vmatprep.mubr.msk.f32.mxu1 %vm2494_vm0, %v2495_v9 }
 0x2d1   :  { %2245 = vmatprep.subr.bf16.mxu0 %v2493_v3 }
 0x2d3   :  { %2244 = vmatpush3.bf16.msra.mxu1 %v2582_v13 }
 0x2d4   :  { %2251 = vmatprep.subr.bf16.mxu1 %v2493_v3 }
 0x39d   :  { %v330_v59 = vpop.f32.mrb[2].mxu0 }
 0x39e   :  { %v334_v60 = vadd.f32 %v1899_v58, %v330_v59  ;;  %v2065_v61 = vpop.f32.mrb[3].mxu0 }
 0x3a0   :  { %2333 = vtanh.f32 %v334_v60  ;;  %v1901_v6 = vmul.f32 -1.442695, %v334_v60 }
 0x3a1   :  { %v431_v63 = vpop.f32.mrb[2].mxu1 }
 0x3a2   :  { %v435_v0 = vadd.f32 %v1902_v62, %v431_v63  ;;  %v2076_v1 = vpop.f32.mrb[3].mxu1 }
 0x3a4   :  { %2335 = vtanh.f32 %v435_v0  ;;  %v1904_v7 = vmul.f32 -1.442695, %v435_v0 }
 0x3a5   :  { %2337 = vpow2.f32 %v1901_v6 }
 0x3a6   :  { %2339 = vpow2.f32 %v1904_v7 }
 0x3aa   :  { %v2334_v2 = vpop.eup %2333 }
 0x3ab   :  { %344 = vrot.lane.b32.xlu1 %v2334_v2, %s2497_s21 }
 0x3ae   :  { %v2336_v5 = vpop.eup %2335 }
 0x3af   :  { %445 = vrot.lane.b32.xlu0 %v2336_v5, %s2497_s21  ;;  %v2338_v10 = vpop.eup %2337 }
 0x3b0   :  { %v338_v11 = vadd.f32 1.0, %v2338_v10  ;;  %v2340_v15 = vpop.eup %2339  ;;  %v696_v10 = vsel %vm694_vm11, 1, %v2496_v14 }
 0x3b1   :  { %v439_v16 = vadd.f32 1.0, %v2340_v15  ;;  %v703_v15 = vsel %vm695_vm12, 1, %v2496_v14 }
 0x3b2   :  { %2341 = vrcp.f32 %v338_v11 }
 0x3b3   :  { %2343 = vrcp.f32 %v439_v16 }
 0x3bc   :  { %v2342_v17 = vpop.eup %2341 }
 0x3bd   :  { %v2344_v20 = vpop.eup %2343  ;;  %v342_v27 = vmul.f32 %v2342_v17, %v2685_v26 }
 0x3be   :  { %v443_v31 = vmul.f32 %v2344_v20, %v2693_v30 }
 0x41d   :  { %v345_v18 = vpop.permute.xlu1 %344 }
 0x41e   :  { %v347_v19 = vmul.f32 %v2342_v17, %v345_v18 }
 0x420   :  { %349 = vrot.lane.b32.xlu1 %v347_v19, %s2497_s21 }
 0x421   :  { %v446_v21 = vpop.permute.xlu0 %445 }
 0x422   :  { %v448_v23 = vmul.f32 %v2344_v20, %v446_v21 }
 0x424   :  { %464 = vperm.xlu1 %2316, %v462_v22   ;;  %450 = vrot.lane.b32.xlu0 %v448_v23, %s2497_s21 }
 0x428   :  { %471 = vperm.xlu0 %2315, %v469_v25  }
 0x492   :  { %v350_v28 = vpop.permute.xlu1 %349 }
 0x493   :  { %v2688_v29 = vadd.f32 %v350_v28, %v342_v27 }
 0x495   :  { %2345 = vtanh.f32 %v2688_v29 }
 0x496   :  { %v451_v32 = vpop.permute.xlu0 %450 }
 0x497   :  { %v2697_v33 = vadd.f32 %v451_v32, %v443_v31 }
 0x499   :  { %2347 = vtanh.f32 %v2697_v33 }
 0x49f   :  { %v2346_v34 = vpop.eup %2345 }
 0x4a0   :  { %355 = vrot.lane.b32.xlu1 %v2346_v34, %s2497_s21 }
 0x4a3   :  { %v2348_v35 = vpop.eup %2347  ;;  %v2702_v36 = vpop.permute.xlu1 %464 }
 0x4a4   :  { %456 = vrot.lane.b32.xlu0 %v2348_v35, %s2497_s21  ;;  %vm466_vm9 = vcmp.eq.s32.totalorder %v2702_v36, 1 }
 0x4a5   :  { %v2760_v16 = vsel %vm466_vm9, %v2688_v29, %v2685_v26 }
 0x4a7   :  { %v2704_v37 = vpop.permute.xlu0 %471 }
 0x4a8   :  { %vm473_vm10 = vcmp.eq.s32.totalorder %v2704_v37, 1 }
 0x512   :  { %v356_v38 = vpop.permute.xlu1 %355 }
 0x513   :  { %v2706_v39 = vmul.f32 %v2342_v17, %v356_v38 }
 0x515   :  { %v2713_v40 = vsel %vm466_vm9, %v2706_v39, %v2639_v52  ;;  %v1910_v52 = vld [vmem:[%s3248_s2 + $0x14] sm:$0xf] }
 0x516   :  { %493 = vrot.lane.b32.xlu1 %v2713_v40, %s2498_s0  ;;  %v457_v41 = vpop.permute.xlu0 %456 }
 0x517   :  { %v2717_v42 = vmul.f32 %v2344_v20, %v457_v41  ;;  %v2769_v20 = vsel %vm473_vm10, %v2697_v33, %v2693_v30 }
 0x519   :  { %v2724_v43 = vsel %vm473_vm10, %v2717_v42, %v2646_v55 }
 0x51a   :  { %595 = vrot.lane.b32.xlu0 %v2724_v43, %s2498_s0 }
 0x588   :  { %v494_v44 = vpop.permute.xlu1 %493 }
 0x589   :  { %2086 = vmatmul.mubr.msk.f32.vlgmr.msra.gmra.mrb[4].mxu0 %vm35_vm6, %v494_v44 }
 0x58a   :  { %2247 = vmatpush3.bf16.msra.mxu0 %v2553_v4  ;;  %2107 = vmatprep.mubr.msk.f32.mxu0 %vm2494_vm0, %v2495_v9 }
 0x58b   :  { %2248 = vmatprep.subr.bf16.mxu0 %v2493_v3 }
 0x58c   :  { %v596_v45 = vpop.permute.xlu0 %595 }
 0x58d   :  { %2097 = vmatmul.mubr.msk.f32.vlgmr.msra.gmra.mrb[4].mxu1 %vm35_vm6, %v596_v45  ;;  %v1918_v45 = vld [vmem:[%s3248_s2 + $0x10] sm:$0xf] }
 0x58e   :  { %2250 = vmatpush3.bf16.msra.mxu0 %v2578_v12  ;;  %2253 = vmatpush3.bf16.msra.mxu1 %v2565_v8 }
 0x58f   :  { %2254 = vmatprep.subr.bf16.mxu1 %v2493_v3  ;;  %2118 = vmatprep.mubr.msk.f32.mxu1 %vm2494_vm0, %v2495_v9 }
 0x590   :  { %2257 = vmatprep.subr.bf16.mxu0 %v2493_v3 }
 0x592   :  { %2256 = vmatpush3.bf16.msra.mxu1 %v2582_v13 }
 0x593   :  { %2263 = vmatprep.subr.bf16.mxu1 %v2493_v3 }
 0x65c   :  { %v563_v47 = vpop.f32.mrb[4].mxu0 }
 0x65d   :  { %v567_v50 = vadd.f32 %v1907_v46, %v563_v47  ;;  %v2087_v51 = vpop.f32.mrb[5].mxu0 }
 0x65f   :  { %2349 = vtanh.f32 %v567_v50  ;;  %v1909_v59 = vmul.f32 -1.442695, %v567_v50 }
 0x660   :  { %v665_v53 = vpop.f32.mrb[4].mxu1 }
 0x661   :  { %v669_v54 = vadd.f32 %v1910_v52, %v665_v53  ;;  %v2098_v56 = vpop.f32.mrb[5].mxu1 }
 0x663   :  { %2351 = vtanh.f32 %v669_v54  ;;  %v1912_v60 = vmul.f32 -1.442695, %v669_v54 }
 0x664   :  { %2353 = vpow2.f32 %v1909_v59 }
 0x665   :  { %2355 = vpow2.f32 %v1912_v60 }
 0x669   :  { %v2350_v57 = vpop.eup %2349 }
 0x66a   :  { %577 = vrot.lane.b32.xlu1 %v2350_v57, %s2497_s21 }
 0x66d   :  { %v2352_v58 = vpop.eup %2351 }
 0x66e   :  { %679 = vrot.lane.b32.xlu0 %v2352_v58, %s2497_s21  ;;  %v2354_v61 = vpop.eup %2353 }
 0x66f   :  { %v571_v62 = vadd.f32 1.0, %v2354_v61  ;;  %v2356_v63 = vpop.eup %2355 }
 0x670   :  { %v673_v0 = vadd.f32 1.0, %v2356_v63 }
 0x671   :  { %2357 = vrcp.f32 %v571_v62 }
 0x672   :  { %2359 = vrcp.f32 %v673_v0 }
 0x67b   :  { %v2358_v1 = vpop.eup %2357 }
 0x67c   :  { %v2360_v6 = vpop.eup %2359  ;;  %v575_v17 = vmul.f32 %v2358_v1, %v2760_v16 }
 0x67d   :  { %v677_v21 = vmul.f32 %v2360_v6, %v2769_v20 }
 0x6dc   :  { %v578_v2 = vpop.permute.xlu1 %577 }
 0x6dd   :  { %v580_v5 = vmul.f32 %v2358_v1, %v578_v2 }
 0x6df   :  { %582 = vrot.lane.b32.xlu1 %v580_v5, %s2497_s21  ;;  %v937_v5 = vsel %vm929_vm1, 1, %v2496_v14 }
 0x6e0   :  { %v680_v7 = vpop.permute.xlu0 %679 }
 0x6e1   :  { %v682_v11 = vmul.f32 %v2360_v6, %v680_v7 }
 0x6e3   :  { %698 = vperm.xlu1 %2316, %v696_v10   ;;  %684 = vrot.lane.b32.xlu0 %v682_v11, %s2497_s21 }
 0x6e7   :  { %705 = vperm.xlu0 %2315, %v703_v15  }
 0x751   :  { %v583_v18 = vpop.permute.xlu1 %582 }
 0x752   :  { %v2763_v19 = vadd.f32 %v583_v18, %v575_v17 }
 0x754   :  { %2361 = vtanh.f32 %v2763_v19 }
 0x755   :  { %v685_v22 = vpop.permute.xlu0 %684 }
 0x756   :  { %v2773_v23 = vadd.f32 %v685_v22, %v677_v21 }
 0x758   :  { %2363 = vtanh.f32 %v2773_v23 }
 0x75e   :  { %v2362_v25 = vpop.eup %2361 }
 0x75f   :  { %588 = vrot.lane.b32.xlu1 %v2362_v25, %s2497_s21 }
 0x762   :  { %v2364_v26 = vpop.eup %2363  ;;  %v2778_v27 = vpop.permute.xlu1 %698 }
 0x763   :  { %690 = vrot.lane.b32.xlu0 %v2364_v26, %s2497_s21  ;;  %vm700_vm13 = vcmp.eq.s32.totalorder %v2778_v27, 1 }
 0x766   :  { %v2780_v28 = vpop.permute.xlu0 %705 }
 0x767   :  { %vm707_vm14 = vcmp.eq.s32.totalorder %v2780_v28, 1 }
 0x768   :  { %v2845_v24 = vsel %vm707_vm14, %v2773_v23, %v2769_v20 }
 0x7d1   :  { %v589_v29 = vpop.permute.xlu1 %588 }
 0x7d2   :  { %v2782_v30 = vmul.f32 %v2358_v1, %v589_v29  ;;  %v930_v1 = vsel %vm928_vm15, 1, %v2496_v14 }
 0x7d4   :  { %v2789_v31 = vsel %vm700_vm13, %v2782_v30, %v2713_v40  ;;  %v1915_v40 = vld [vmem:[%s3247_s1 + $0xc] sm:$0xf] }
 0x7d5   :  { %727 = vrot.lane.b32.xlu1 %v2789_v31, %s2498_s0  ;;  %v691_v32 = vpop.permute.xlu0 %690 }
 0x7d6   :  { %v2793_v33 = vmul.f32 %v2360_v6, %v691_v32  ;;  %v2836_v6 = vsel %vm700_vm13, %v2763_v19, %v2760_v16 }
 0x7d8   :  { %v2800_v34 = vsel %vm707_vm14, %v2793_v33, %v2724_v43 }
 0x7d9   :  { %829 = vrot.lane.b32.xlu0 %v2800_v34, %s2498_s0 }
 0x847   :  { %v728_v35 = vpop.permute.xlu1 %727 }
 0x848   :  { %2108 = vmatmul.mubr.msk.f32.vlgmr.msra.gmra.mrb[6].mxu0 %vm35_vm6, %v728_v35 }
 0x849   :  { %2259 = vmatpush3.bf16.msra.mxu0 %v2553_v4  ;;  %2129 = vmatprep.mubr.msk.f32.mxu0 %vm2494_vm0, %v2495_v9 }
 0x84a   :  { %2260 = vmatprep.subr.bf16.mxu0 %v2493_v3 }
 0x84b   :  { %v830_v38 = vpop.permute.xlu0 %829 }
 0x84c   :  { %2119 = vmatmul.mubr.msk.f32.vlgmr.msra.gmra.mrb[6].mxu1 %vm35_vm6, %v830_v38 }
 0x84d   :  { %2262 = vmatpush3.bf16.msra.mxu0 %v2578_v12  ;;  %2265 = vmatpush3.bf16.msra.mxu1 %v2565_v8 }
 0x84e   :  { %2266 = vmatprep.subr.bf16.mxu1 %v2493_v3  ;;  %2140 = vmatprep.mubr.msk.f32.mxu1 %vm2494_vm0, %v2495_v9 }
 0x84f   :  { %2269 = vmatprep.subr.bf16.mxu0 %v2493_v3 }
 0x851   :  { %2268 = vmatpush3.bf16.msra.mxu1 %v2582_v13 }
 0x852   :  { %2275 = vmatprep.subr.bf16.mxu1 %v2493_v3 }
 0x91b   :  { %v797_v41 = vpop.f32.mrb[6].mxu0 }
 0x91c   :  { %v801_v43 = vadd.f32 %v1915_v40, %v797_v41  ;;  %v2109_v44 = vpop.f32.mrb[7].mxu0  ;;  %v1926_v41 = vld [vmem:[%s3248_s2 + $0xc] sm:$0xf] }
 0x91e   :  { %2365 = vtanh.f32 %v801_v43  ;;  %v1917_v53 = vmul.f32 -1.442695, %v801_v43 }
 0x91f   :  { %v899_v46 = vpop.f32.mrb[6].mxu1 }
 0x920   :  { %v903_v47 = vadd.f32 %v1918_v45, %v899_v46  ;;  %v2120_v50 = vpop.f32.mrb[7].mxu1 }
 0x922   :  { %2367 = vtanh.f32 %v903_v47  ;;  %v1920_v54 = vmul.f32 -1.442695, %v903_v47 }
 0x923   :  { %2369 = vpow2.f32 %v1917_v53 }
 0x924   :  { %2371 = vpow2.f32 %v1920_v54 }
 0x928   :  { %v2366_v51 = vpop.eup %2365 }
 0x929   :  { %811 = vrot.lane.b32.xlu1 %v2366_v51, %s2497_s21 }
 0x92c   :  { %v2368_v52 = vpop.eup %2367 }
 0x92d   :  { %913 = vrot.lane.b32.xlu0 %v2368_v52, %s2497_s21  ;;  %v2370_v56 = vpop.eup %2369 }
 0x92e   :  { %v805_v57 = vadd.f32 1.0, %v2370_v56  ;;  %v2372_v58 = vpop.eup %2371 }
 0x92f   :  { %v907_v59 = vadd.f32 1.0, %v2372_v58 }
 0x930   :  { %2373 = vrcp.f32 %v805_v57 }
 0x931   :  { %2375 = vrcp.f32 %v907_v59 }
 0x93a   :  { %v2374_v60 = vpop.eup %2373 }
 0x93b   :  { %v2376_v63 = vpop.eup %2375  ;;  %v809_v7 = vmul.f32 %v2374_v60, %v2836_v6 }
 0x93c   :  { %v911_v14 = vmul.f32 %v2376_v63, %v2845_v24 }
 0x99b   :  { %v812_v61 = vpop.permute.xlu1 %811 }
 0x99c   :  { %v814_v62 = vmul.f32 %v2374_v60, %v812_v61 }
 0x99e   :  { %816 = vrot.lane.b32.xlu1 %v814_v62, %s2497_s21 }
 0x99f   :  { %v914_v0 = vpop.permute.xlu0 %913 }
 0x9a0   :  { %v916_v2 = vmul.f32 %v2376_v63, %v914_v0 }
 0x9a2   :  { %932 = vperm.xlu1 %2316, %v930_v1   ;;  %918 = vrot.lane.b32.xlu0 %v916_v2, %s2497_s21 }
 0x9a6   :  { %939 = vperm.xlu0 %2315, %v937_v5  }
 0xa10   :  { %v817_v10 = vpop.permute.xlu1 %816 }
 0xa11   :  { %v2839_v11 = vadd.f32 %v817_v10, %v809_v7 }
 0xa13   :  { %2377 = vtanh.f32 %v2839_v11 }
 0xa14   :  { %v919_v15 = vpop.permute.xlu0 %918 }
 0xa15   :  { %v2849_v17 = vadd.f32 %v919_v15, %v911_v14 }
 0xa17   :  { %2379 = vtanh.f32 %v2849_v17 }
 0xa1d   :  { %v2378_v16 = vpop.eup %2377 }
 0xa1e   :  { %822 = vrot.lane.b32.xlu1 %v2378_v16, %s2497_s21 }
 0xa21   :  { %v2380_v18 = vpop.eup %2379  ;;  %v2854_v19 = vpop.permute.xlu1 %932 }
 0xa22   :  { %924 = vrot.lane.b32.xlu0 %v2380_v18, %s2497_s21  ;;  %vm934_vm2 = vcmp.eq.s32.totalorder %v2854_v19, 1 }
 0xa25   :  { %v2856_v21 = vpop.permute.xlu0 %939 }
 0xa26   :  { %vm941_vm7 = vcmp.eq.s32.totalorder %v2856_v21, 1 }
 0xa27   :  { %v2917_v5 = vsel %vm941_vm7, %v2849_v17, %v2845_v24 }
 0xa90   :  { %v823_v20 = vpop.permute.xlu1 %822 }
 0xa91   :  { %v2858_v22 = vmul.f32 %v2374_v60, %v823_v20 }
 0xa93   :  { %v2865_v23 = vsel %vm934_vm2, %v2858_v22, %v2789_v31 }
 0xa94   :  { %961 = vrot.lane.b32.xlu1 %v2865_v23, %s2498_s0  ;;  %v925_v25 = vpop.permute.xlu0 %924 }
 0xa95   :  { %v2869_v26 = vmul.f32 %v2376_v63, %v925_v25  ;;  %v2908_v63 = vsel %vm934_vm2, %v2839_v11, %v2836_v6 }
 0xa97   :  { %v2876_v29 = vsel %vm941_vm7, %v2869_v26, %v2800_v34  ;;  %v1923_v34 = vld [vmem:[%s3247_s1 + $0x10] sm:$0xf] }
 0xa98   :  { %1063 = vrot.lane.b32.xlu0 %v2876_v29, %s2498_s0 }
 0xb06   :  { %v962_v32 = vpop.permute.xlu1 %961 }
 0xb07   :  { %2130 = vmatmul.mubr.msk.f32.vlgmr.msra.gmra.mrb[8].mxu0 %vm35_vm6, %v962_v32 }
 0xb08   :  { %2271 = vmatpush3.bf16.msra.mxu0 %v2553_v4  ;;  %2151 = vmatprep.mubr.msk.f32.mxu0 %vm2494_vm0, %v2495_v9 }
 0xb09   :  { %2272 = vmatprep.subr.bf16.mxu0 %v2493_v3 }
 0xb0a   :  { %v1064_v31 = vpop.permute.xlu0 %1063 }
 0xb0b   :  { %2141 = vmatmul.mubr.msk.f32.vlgmr.msra.gmra.mrb[8].mxu1 %vm35_vm6, %v1064_v31 }
 0xb0c   :  { %2274 = vmatpush3.bf16.msra.mxu0 %v2578_v12  ;;  %2277 = vmatpush3.bf16.msra.mxu1 %v2565_v8 }
 0xb0d   :  { %2278 = vmatprep.subr.bf16.mxu1 %v2493_v3  ;;  %2162 = vmatprep.mubr.msk.f32.mxu1 %vm2494_vm0, %v2495_v9 }
 0xb0e   :  { %2281 = vmatprep.subr.bf16.mxu0 %v2493_v3 }
 0xb10   :  { %2280 = vmatpush3.bf16.msra.mxu1 %v2582_v13 }
 0xb11   :  { %2287 = vmatprep.subr.bf16.mxu1 %v2493_v3 }
 0xbda   :  { %v1031_v35 = vpop.f32.mrb[8].mxu0 }
 0xbdb   :  { %v1035_v38 = vadd.f32 %v1923_v34, %v1031_v35  ;;  %v2131_v40 = vpop.f32.mrb[9].mxu0  ;;  %v1934_v35 = vld [vmem:[%s3248_s2 + $0x8] sm:$0xf] }
 0xbdd   :  { %2381 = vtanh.f32 %v1035_v38  ;;  %v1925_v50 = vmul.f32 -1.442695, %v1035_v38 }
 0xbde   :  { %v1133_v43 = vpop.f32.mrb[8].mxu1 }
 0xbdf   :  { %v1137_v44 = vadd.f32 %v1926_v41, %v1133_v43  ;;  %v2142_v45 = vpop.f32.mrb[9].mxu1 }
 0xbe1   :  { %2383 = vtanh.f32 %v1137_v44  ;;  %v1928_v51 = vmul.f32 -1.442695, %v1137_v44 }
 0xbe2   :  { %2385 = vpow2.f32 %v1925_v50 }
 0xbe3   :  { %2387 = vpow2.f32 %v1928_v51 }
 0xbe7   :  { %v2382_v46 = vpop.eup %2381 }
 0xbe8   :  { %1045 = vrot.lane.b32.xlu1 %v2382_v46, %s2497_s21 }
 0xbeb   :  { %v2384_v47 = vpop.eup %2383 }
 0xbec   :  { %1147 = vrot.lane.b32.xlu0 %v2384_v47, %s2497_s21  ;;  %v2386_v52 = vpop.eup %2385 }
 0xbed   :  { %v1039_v53 = vadd.f32 1.0, %v2386_v52  ;;  %v2388_v54 = vpop.eup %2387 }
 0xbee   :  { %v1141_v56 = vadd.f32 1.0, %v2388_v54 }
 0xbef   :  { %2389 = vrcp.f32 %v1039_v53 }
 0xbf0   :  { %2391 = vrcp.f32 %v1141_v56 }
 0xbf9   :  { %v2390_v57 = vpop.eup %2389 }
 0xbfa   :  { %v2392_v60 = vpop.eup %2391  ;;  %v1043_v0 = vmul.f32 %v2390_v57, %v2908_v63 }
 0xbfb   :  { %v1145_v7 = vmul.f32 %v2392_v60, %v2917_v5 }
 0xc5a   :  { %v1046_v58 = vpop.permute.xlu1 %1045 }
 0xc5b   :  { %v1048_v59 = vmul.f32 %v2390_v57, %v1046_v58 }
 0xc5d   :  { %1050 = vrot.lane.b32.xlu1 %v1048_v59, %s2497_s21 }
 0xc5e   :  { %v1148_v61 = vpop.permute.xlu0 %1147 }
 0xc5f   :  { %v1150_v62 = vmul.f32 %v2392_v60, %v1148_v61 }
 0xc61   :  { %1152 = vrot.lane.b32.xlu0 %v1150_v62, %s2497_s21 }
 0xccf   :  { %v1051_v1 = vpop.permute.xlu1 %1050 }
 0xcd0   :  { %v2911_v2 = vadd.f32 %v1051_v1, %v1043_v0 }
 0xcd2   :  { %2393 = vtanh.f32 %v2911_v2 }
 0xcd3   :  { %v1153_v10 = vpop.permute.xlu0 %1152 }
 0xcd4   :  { %v2921_v14 = vadd.f32 %v1153_v10, %v1145_v7 }
 0xcd6   :  { %2395 = vtanh.f32 %v2921_v14  ;;  %v2983_v1 = vsel %vm934_vm2, %v2921_v14, %v2917_v5 }
 0xcdc   :  { %v2394_v6 = vpop.eup %2393 }
 0xcdd   :  { %1056 = vrot.lane.b32.xlu1 %v2394_v6, %s2497_s21 }
 0xce0   :  { %v2396_v11 = vpop.eup %2395 }
 0xce1   :  { %1158 = vrot.lane.b32.xlu0 %v2396_v11, %s2497_s21 }
 0xd4f   :  { %v1057_v15 = vpop.permute.xlu1 %1056 }
 0xd50   :  { %v2926_v16 = vmul.f32 %v2390_v57, %v1057_v15 }
 0xd52   :  { %v2932_v24 = vsel %vm941_vm7, %v2926_v16, %v2865_v23 }
 0xd53   :  { %1181 = vrot.lane.b32.xlu1 %v2932_v24, %s2498_s0  ;;  %v1159_v17 = vpop.permute.xlu0 %1158 }
 0xd54   :  { %v2936_v18 = vmul.f32 %v2392_v60, %v1159_v17  ;;  %v2974_v60 = vsel %vm941_vm7, %v2911_v2, %v2908_v63 }
 0xd56   :  { %v2942_v20 = vsel %vm934_vm2, %v2936_v18, %v2876_v29  ;;  %v1931_v29 = vld [vmem:[%s3247_s1 + $0x14] sm:$0xf] }
 0xd57   :  { %1283 = vrot.lane.b32.xlu0 %v2942_v20, %s2498_s0 }
 0xdc5   :  { %v1182_v25 = vpop.permute.xlu1 %1181 }
 0xdc6   :  { %2152 = vmatmul.mubr.msk.f32.vlgmr.msra.gmra.mrb[10].mxu0 %vm35_vm6, %v1182_v25 }
 0xdc7   :  { %2283 = vmatpush3.bf16.msra.mxu0 %v2553_v4  ;;  %2173 = vmatprep.mubr.msk.f32.mxu0 %vm2494_vm0, %v2495_v9 }
 0xdc8   :  { %2284 = vmatprep.subr.bf16.mxu0 %v2493_v3 }
 0xdc9   :  { %v1284_v23 = vpop.permute.xlu0 %1283 }
 0xdca   :  { %2163 = vmatmul.mubr.msk.f32.vlgmr.msra.gmra.mrb[10].mxu1 %vm35_vm6, %v1284_v23 }
 0xdcb   :  { %2286 = vmatpush3.bf16.msra.mxu0 %v2578_v12  ;;  %2289 = vmatpush3.bf16.msra.mxu1 %v2565_v8 }
 0xdcc   :  { %2290 = vmatprep.subr.bf16.mxu1 %v2493_v3  ;;  %2184 = vmatprep.mubr.msk.f32.mxu1 %vm2494_vm0, %v2495_v9 }
 0xdcd   :  { %2293 = vmatprep.subr.bf16.mxu0 %v2493_v3 }
 0xdcf   :  { %2292 = vmatpush3.bf16.msra.mxu1 %v2582_v13 }
 0xdd0   :  { %2299 = vmatprep.subr.bf16.mxu1 %v2493_v3 }
 0xe99   :  { %v1251_v32 = vpop.f32.mrb[10].mxu0 }
 0xe9a   :  { %v1255_v31 = vadd.f32 %v1931_v29, %v1251_v32  ;;  %v2153_v34 = vpop.f32.mrb[11].mxu0 }
 0xe9c   :  { %2397 = vtanh.f32 %v1255_v31  ;;  %v1933_v45 = vmul.f32 -1.442695, %v1255_v31 }
 0xe9d   :  { %v1353_v38 = vpop.f32.mrb[10].mxu1 }
 0xe9e   :  { %v1357_v40 = vadd.f32 %v1934_v35, %v1353_v38  ;;  %v2164_v41 = vpop.f32.mrb[11].mxu1 }
 0xea0   :  { %2399 = vtanh.f32 %v1357_v40  ;;  %v1936_v46 = vmul.f32 -1.442695, %v1357_v40 }
 0xea1   :  { %2401 = vpow2.f32 %v1933_v45 }
 0xea2   :  { %2403 = vpow2.f32 %v1936_v46 }
 0xea6   :  { %v2398_v43 = vpop.eup %2397 }
 0xea7   :  { %1265 = vrot.lane.b32.xlu1 %v2398_v43, %s2497_s21 }
 0xeaa   :  { %v2400_v44 = vpop.eup %2399 }
 0xeab   :  { %1367 = vrot.lane.b32.xlu0 %v2400_v44, %s2497_s21  ;;  %v2402_v47 = vpop.eup %2401 }
 0xeac   :  { %v1259_v50 = vadd.f32 1.0, %v2402_v47  ;;  %v2404_v51 = vpop.eup %2403 }
 0xead   :  { %v1361_v52 = vadd.f32 1.0, %v2404_v51 }
 0xeae   :  { %2405 = vrcp.f32 %v1259_v50 }
 0xeaf   :  { %2407 = vrcp.f32 %v1361_v52 }
 0xeb8   :  { %v2406_v53 = vpop.eup %2405 }
 0xeb9   :  { %v2408_v57 = vpop.eup %2407  ;;  %v1263_v61 = vmul.f32 %v2406_v53, %v2974_v60 }
 0xeba   :  { %v1365_v7 = vmul.f32 %v2408_v57, %v2983_v1 }
 0xf19   :  { %v1266_v54 = vpop.permute.xlu1 %1265 }
 0xf1a   :  { %v1268_v56 = vmul.f32 %v2406_v53, %v1266_v54 }
 0xf1c   :  { %1270 = vrot.lane.b32.xlu1 %v1268_v56, %s2497_s21 }
 0xf1d   :  { %v1368_v58 = vpop.permute.xlu0 %1367 }
 0xf1e   :  { %v1370_v59 = vmul.f32 %v2408_v57, %v1368_v58 }
 0xf20   :  { %1372 = vrot.lane.b32.xlu0 %v1370_v59, %s2497_s21 }
 0xf8e   :  { %v1271_v62 = vpop.permute.xlu1 %1270 }
 0xf8f   :  { %v2977_v0 = vadd.f32 %v1271_v62, %v1263_v61 }
 0xf91   :  { %2409 = vtanh.f32 %v2977_v0  ;;  %v1383_v52 = vsel %vm707_vm14, %v2977_v0, %v2974_v60 }
 0xf92   :  { %v1373_v10 = vpop.permute.xlu0 %1372 }
 0xf93   :  { %v2987_v6 = vadd.f32 %v1373_v10, %v1365_v7 }
 0xf95   :  { %2411 = vtanh.f32 %v2987_v6 }
 0xf9b   :  { %v2410_v63 = vpop.eup %2409 }
 0xf9c   :  { %1276 = vrot.lane.b32.xlu1 %v2410_v63, %s2497_s21 }
 0xf9f   :  { %v2412_v2 = vpop.eup %2411 }
 0xfa0   :  { %1378 = vrot.lane.b32.xlu0 %v2412_v2, %s2497_s21 }
0x100e   :  { %v1277_v11 = vpop.permute.xlu1 %1276 }
0x100f   :  { %v2992_v15 = vmul.f32 %v2406_v53, %v1277_v11 }
0x1011   :  { %v2998_v5 = vsel %vm707_vm14, %v2992_v15, %v2932_v24 }
0x1012   :  { %1401 = vrot.lane.b32.xlu1 %v2998_v5, %s2498_s0  ;;  %v1379_v14 = vpop.permute.xlu0 %1378 }
0x1013   :  { %v3002_v17 = vmul.f32 %v2408_v57, %v1379_v14  ;;  %v1385_v57 = vsel %vm700_vm13, %v2987_v6, %v2983_v1 }
0x1015   :  { %v3008_v25 = vsel %vm700_vm13, %v3002_v17, %v2942_v20 }
0x1016   :  { %1503 = vrot.lane.b32.xlu0 %v3008_v25, %s2498_s0 }
0x1084   :  { %v1402_v23 = vpop.permute.xlu1 %1401 }
0x1085   :  { %2174 = vmatmul.mubr.msk.f32.vlgmr.msra.gmra.mrb[12].mxu0 %vm35_vm6, %v1402_v23 }
0x1086   :  { %2295 = vmatpush3.bf16.msra.mxu0 %v2553_v4  ;;  %2195 = vmatprep.mubr.msk.f32.mxu0 %vm2494_vm0, %v2495_v9  ;;  %v1939_v4 = vld [vmem:[%s3247_s1 + $0x18] sm:$0xf] }
0x1087   :  { %2296 = vmatprep.subr.bf16.mxu0 %v2493_v3 }
0x1088   :  { %v1504_v24 = vpop.permute.xlu0 %1503 }
0x1089   :  { %2185 = vmatmul.mubr.msk.f32.vlgmr.msra.gmra.mrb[12].mxu1 %vm35_vm6, %v1504_v24 }
0x108a   :  { %2298 = vmatpush3.bf16.msra.mxu0 %v2578_v12  ;;  %2301 = vmatpush3.bf16.msra.mxu1 %v2565_v8  ;;  %v1942_v12 = vld [vmem:[%s3248_s2 + $0x4] sm:$0xf] }
0x108b   :  { %2302 = vmatprep.subr.bf16.mxu1 %v2493_v3  ;;  %2206 = vmatprep.mubr.msk.f32.mxu1 %vm2494_vm0, %v2495_v9  ;;  %vm258_vm0 = vcmask 519424  }
0x108e   :  { %2304 = vmatpush3.bf16.msra.mxu1 %v2582_v13 }
0x1158   :  { %v1471_v20 = vpop.f32.mrb[12].mxu0 }
0x1159   :  { %v1475_v29 = vadd.f32 %v1939_v4, %v1471_v20  ;;  %v2175_v32 = vpop.f32.mrb[13].mxu0 }
0x115b   :  { %2413 = vtanh.f32 %v1475_v29  ;;  %v1941_v13 = vmul.f32 -1.442695, %v1475_v29 }
0x115c   :  { %v1573_v8 = vpop.f32.mrb[12].mxu1 }
0x115d   :  { %v1577_v31 = vadd.f32 %v1942_v12, %v1573_v8  ;;  %v2186_v3 = vpop.f32.mrb[13].mxu1 }
0x115f   :  { %2415 = vtanh.f32 %v1577_v31  ;;  %v1944_v35 = vmul.f32 -1.442695, %v1577_v31 }
0x1160   :  { %2417 = vpow2.f32 %v1941_v13 }
0x1161   :  { %2419 = vpow2.f32 %v1944_v35 }
0x1165   :  { %v2414_v34 = vpop.eup %2413 }
0x1166   :  { %1485 = vrot.lane.b32.xlu1 %v2414_v34, %s2497_s21 }
0x1169   :  { %v2416_v9 = vpop.eup %2415 }
0x116a   :  { %1587 = vrot.lane.b32.xlu0 %v2416_v9, %s2497_s21  ;;  %v2418_v38 = vpop.eup %2417 }
0x116b   :  { %v1479_v40 = vadd.f32 1.0, %v2418_v38  ;;  %v2420_v41 = vpop.eup %2419 }
0x116c   :  { %v1581_v43 = vadd.f32 1.0, %v2420_v41 }
0x116d   :  { %2421 = vrcp.f32 %v1479_v40 }
0x116e   :  { %2423 = vrcp.f32 %v1581_v43 }
0x1177   :  { %v2422_v44 = vpop.eup %2421 }
0x1178   :  { %v2424_v47 = vpop.eup %2423  ;;  %v1483_v53 = vmul.f32 %v2422_v44, %v1383_v52 }
0x1179   :  { %v1585_v58 = vmul.f32 %v2424_v47, %v1385_v57 }
0x11d8   :  { %v1486_v45 = vpop.permute.xlu1 %1485 }
0x11d9   :  { %v1488_v46 = vmul.f32 %v2422_v44, %v1486_v45 }
0x11db   :  { %1490 = vrot.lane.b32.xlu1 %v1488_v46, %s2497_s21 }
0x11dc   :  { %v1588_v50 = vpop.permute.xlu0 %1587 }
0x11dd   :  { %v1590_v51 = vmul.f32 %v2424_v47, %v1588_v50 }
0x11df   :  { %1592 = vrot.lane.b32.xlu0 %v1590_v51, %s2497_s21 }
0x124d   :  { %v1491_v54 = vpop.permute.xlu1 %1490 }
0x124e   :  { %v1493_v56 = vadd.f32 %v1491_v54, %v1483_v53 }
0x1250   :  { %2425 = vtanh.f32 %v1493_v56  ;;  %v1603_v45 = vsel %vm473_vm10, %v1493_v56, %v1383_v52  ;;  %v483_v52 = vsel %vm473_vm10, %v2717_v42, 0.0  ;;  %v476_v56 = vsel %vm466_vm9, %v2706_v39, 0.0 }
0x1251   :  { %v1593_v59 = vpop.permute.xlu0 %1592  ;;  %v951_v39 = vsel %vm941_vm7, %v2869_v26, 0.0  ;;  %v944_v42 = vsel %vm934_vm2, %v2858_v22, 0.0  ;;  %v1172_v26 = vsel %vm934_vm2, %v2936_v18, 0.0  ;;  %v1166_v22 = vsel %vm941_vm7, %v2926_v16, 0.0 }
0x1252   :  { %v1595_v61 = vadd.f32 %v1593_v59, %v1585_v58 }
0x1254   :  { %2427 = vtanh.f32 %v1595_v61  ;;  %v1605_v51 = vsel %vm466_vm9, %v1595_v61, %v1385_v57  ;;  %v717_v57 = vsel %vm707_vm14, %v2793_v33, 0.0  ;;  %v1392_v61 = vsel %vm700_vm13, %v3002_v17, 0.0 }
0x125a   :  { %v2426_v62 = vpop.eup %2425 }
0x125b   :  { %1496 = vrot.lane.b32.xlu1 %v2426_v62, %s2497_s21 }
0x125e   :  { %v2428_v7 = vpop.eup %2427 }
0x125f   :  { %1598 = vrot.lane.b32.xlu0 %v2428_v7, %s2497_s21  ;;  %v1386_v7 = vsel %vm707_vm14, %v2992_v15, 0.0 }
0x12cd   :  { %v1497_v60 = vpop.permute.xlu1 %1496 }
0x12ce   :  { %v3044_v0 = vmul.f32 %v2422_v44, %v1497_v60 }
0x12d0   :  { %v3050_v10 = vsel %vm473_vm10, %v3044_v0, %v2998_v5  ;;  %v1947_v5 = vld [vmem:[%s3247_s1 + $0x1c] sm:$0xf]  ;;  %s2499_s1 = smov 96   ;;  %v1606_v21 = vsel %vm473_vm10, %v3044_v0, 0.0 }
0x12d1   :  { %1621 = vrot.lane.b32.xlu1 %v3050_v10, %s2498_s0  ;;  %v1599_v1 = vpop.permute.xlu0 %1598 }
0x12d2   :  { %v3054_v6 = vmul.f32 %v2424_v47, %v1599_v1 }
0x12d4   :  { %v3060_v63 = vsel %vm466_vm9, %v3054_v6, %v3008_v25  ;;  %v1720_v25 = vld [vmem:[%s3248_s2] sm:$0xf]  ;;  %v1612_v19 = vsel %vm466_vm9, %v3054_v6, 0.0 }
0x12d5   :  { %1722 = vrot.lane.b32.xlu0 %v3060_v63, %s2498_s0 }
0x1343   :  { %v1622_v2 = vpop.permute.xlu1 %1621 }
0x1344   :  { %2196 = vmatmul.mubr.msk.f32.vlgmr.msra.gmra.mrb[14].mxu0 %vm35_vm6, %v1622_v2 }
0x1347   :  { %v1723_v11 = vpop.permute.xlu0 %1722 }
0x1348   :  { %2207 = vmatmul.mubr.msk.f32.vlgmr.msra.gmra.mrb[14].mxu1 %vm35_vm6, %v1723_v11 }
0x1417   :  { %v1691_v14 = vpop.f32.mrb[14].mxu0 }
0x1418   :  { %v1695_v23 = vadd.f32 %v1947_v5, %v1691_v14  ;;  %v2197_v24 = vpop.f32.mrb[15].mxu0 }
0x141a   :  { %2429 = vtanh.f32 %v1695_v23  ;;  %v1949_v8 = vmul.f32 -1.442695, %v1695_v23 }
0x141b   :  { %v1792_v4 = vpop.f32.mrb[14].mxu1 }
0x141c   :  { %v1796_v20 = vadd.f32 %v1792_v4, %v1720_v25  ;;  %v2208_v29 = vpop.f32.mrb[15].mxu1 }
0x141e   :  { %2431 = vtanh.f32 %v1796_v20  ;;  %v1951_v31 = vmul.f32 -1.442695, %v1796_v20 }
0x141f   :  { %2433 = vpow2.f32 %v1949_v8 }
0x1420   :  { %2435 = vpow2.f32 %v1951_v31 }
0x1424   :  { %v2430_v32 = vpop.eup %2429 }
0x1425   :  { %1705 = vrot.lane.b32.xlu1 %v2430_v32, %s2497_s21 }
0x1428   :  { %v2432_v12 = vpop.eup %2431 }
0x1429   :  { %1806 = vrot.lane.b32.xlu0 %v2432_v12, %s2497_s21  ;;  %v2434_v3 = vpop.eup %2433 }
0x142a   :  { %v1699_v34 = vadd.f32 1.0, %v2434_v3  ;;  %v2436_v9 = vpop.eup %2435 }
0x142b   :  { %v1800_v13 = vadd.f32 1.0, %v2436_v9 }
0x142c   :  { %2437 = vrcp.f32 %v1699_v34 }
0x142d   :  { %2439 = vrcp.f32 %v1800_v13 }
0x1436   :  { %v2438_v35 = vpop.eup %2437 }
0x1437   :  { %v2440_v41 = vpop.eup %2439  ;;  %v1703_v46 = vmul.f32 %v2438_v35, %v1603_v45 }
0x1438   :  { %v1804_v53 = vmul.f32 %v2440_v41, %v1605_v51 }
0x1497   :  { %v1706_v38 = vpop.permute.xlu1 %1705 }
0x1498   :  { %v1708_v40 = vmul.f32 %v2438_v35, %v1706_v38 }
0x149a   :  { %1710 = vrot.lane.b32.xlu1 %v1708_v40, %s2497_s21 }
0x149b   :  { %v1807_v43 = vpop.permute.xlu0 %1806 }
0x149c   :  { %v1809_v44 = vmul.f32 %v2440_v41, %v1807_v43 }
0x149e   :  { %1811 = vrot.lane.b32.xlu0 %v1809_v44, %s2497_s21 }
0x150c   :  { %v1711_v47 = vpop.permute.xlu1 %1710 }
0x150d   :  { %v1713_v50 = vadd.f32 %v1711_v47, %v1703_v46 }
0x150f   :  { %2441 = vtanh.f32 %v1713_v50 }
0x1510   :  { %v1812_v54 = vpop.permute.xlu0 %1811 }
0x1511   :  { %v1814_v58 = vadd.f32 %v1812_v54, %v1804_v53 }
0x1513   :  { %2443 = vtanh.f32 %v1814_v58  ;;  %v1824_v33 = vsel %vm237_vm3, %v1814_v58, %v1605_v51 }
0x1519   :  { %v2442_v59 = vpop.eup %2441 }
0x151a   :  { %1716 = vrot.lane.b32.xlu1 %v2442_v59, %s2497_s21 }
0x151d   :  { %v2444_v62 = vpop.eup %2443 }
0x151e   :  { %254 = vrot.lane.b32.xlu1 %v2646_v55, %s2499_s1  ;;  %1817 = vrot.lane.b32.xlu0 %v2444_v62, %s2497_s21  ;;  %v710_v55 = vsel %vm700_vm13, %v2782_v30, 0.0  ;;  %v1822_v30 = vsel %vm244_vm4, %v1713_v50, %v1603_v45 }
0x1522   :  { %485 = vrot.lane.b32.xlu1 %v483_v52, %s2499_s1  ;;  %478 = vrot.lane.b32.xlu0 %v476_v56, %s2498_s0 }
0x1526   :  { %719 = vrot.lane.b32.xlu1 %v717_v57, %s2499_s1  ;;  %712 = vrot.lane.b32.xlu0 %v710_v55, %s2498_s0 }
0x152a   :  { %953 = vrot.lane.b32.xlu1 %v951_v39, %s2499_s1  ;;  %946 = vrot.lane.b32.xlu0 %v944_v42, %s2498_s0 }
0x152e   :  { %1854 = vrot.lane.b32.xlu1 %v1824_v33, %s2499_s1  ;;  %1849 = vrot.lane.b32.xlu0 %v1822_v30, %s2499_s1 }
0x1532   :  { %1174 = vrot.lane.b32.xlu1 %v1172_v26, %s2499_s1  ;;  %1168 = vrot.lane.b32.xlu0 %v1166_v22, %s2498_s0 }
0x1536   :  { %1394 = vrot.lane.b32.xlu1 %v1392_v61, %s2499_s1  ;;  %1388 = vrot.lane.b32.xlu0 %v1386_v7, %s2498_s0 }
0x153a   :  { %1614 = vrot.lane.b32.xlu1 %v1612_v19, %s2499_s1  ;;  %1608 = vrot.lane.b32.xlu0 %v1606_v21, %s2498_s0 }
0x158c   :  { %v1717_v27 = vpop.permute.xlu1 %1716 }
0x158d   :  { %v1719_v16 = vmul.f32 %v2438_v35, %v1717_v27 }
0x158f   :  { %v1821_v28 = vsel %vm244_vm4, %v1719_v16, %v3050_v10  ;;  %v1825_v15 = vsel %vm244_vm4, %v1719_v16, 0.0 }
0x1590   :  { %v255_v18 = vpop.permute.xlu1 %254  ;;  %1838 = vrot.lane.b32.xlu0 %v1821_v28, %s2498_s0  ;;  %v1818_v36 = vpop.permute.xlu0 %1817 }
0x1591   :  { %1898 = vst.msk [vmem:[%s3251_s5 + $0x1c] sm:$0xf] %vm258_vm0, %v255_v18  ;;  %v1820_v37 = vmul.f32 %v2440_v41, %v1818_v36 }
0x1593   :  { %v1823_v17 = vsel %vm237_vm3, %v1820_v37, %v3060_v63  ;;  %v1831_v48 = vsel %vm237_vm3, %v1820_v37, 0.0 }
0x1594   :  { %v486_v60 = vpop.permute.xlu1 %485  ;;  %1827 = vrot.lane.b32.xlu0 %v1825_v15, %s2498_s0  ;;  %1843 = vrot.lane.b32.xlu1 %v1823_v17, %s2498_s0  ;;  %v479_v0 = vpop.permute.xlu0 %478 }
0x1595   :  { %1906 = vst.msk [vmem:[%s3251_s5 + $0x18] sm:$0xf] %vm258_vm0, %v486_v60 }
0x1596   :  { %1905 = vst.msk [vmem:[%s3251_s5 + $0x4] sm:$0xf] %vm251_vm5, %v479_v0 }
0x1598   :  { %v720_v10 = vpop.permute.xlu1 %719  ;;  %1833 = vrot.lane.b32.xlu1 %v1831_v48, %s2499_s1  ;;  %v713_v1 = vpop.permute.xlu0 %712 }
0x1599   :  { %1914 = vst.msk [vmem:[%s3251_s5 + $0x14] sm:$0xf] %vm258_vm0, %v720_v10 }
0x159a   :  { %1913 = vst.msk [vmem:[%s3251_s5 + $0x8] sm:$0xf] %vm251_vm5, %v713_v1 }
0x159c   :  { %v954_v6 = vpop.permute.xlu1 %953  ;;  %v947_v63 = vpop.permute.xlu0 %946 }
0x159d   :  { %1922 = vst.msk [vmem:[%s3251_s5 + $0x10] sm:$0xf] %vm258_vm0, %v954_v6 }
0x159e   :  { %1921 = vst.msk [vmem:[%s3251_s5 + $0xc] sm:$0xf] %vm251_vm5, %v947_v63 }
0x15a0   :  { %v1855_v49 = vpop.permute.xlu1 %1854  ;;  %v1850_v2 = vpop.permute.xlu0 %1849 }
0x15a1   :  { %1858 = vst.msk [vmem:[#allocation4 + $0x4] sm:$0xf] %vm251_vm5, %v1855_v49  ;;  %1852 = vst.msk [vmem:[#allocation4] sm:$0xf] %vm251_vm5, %v1850_v2 }
0x15a2   :  { %2456 = shalt.err (!%p2453_p4)
}
0x15a3   :  { %s2457_s20 = scalar_lea.hbm %s3253_s7, 128 }
0x15a4   :  { %p2458_p5 = scmp.ne.s32.totalorder %s3253_s7, %s2457_s20  ;;  %p2461_p6 = scmp.lt.u32.totalorder %s2457_s20, %s3253_s7 }
0x15a6   :  { %p2463_p7 = pnand %p2461_p6, %p2458_p5 }
0x15a8   :  { %2466 = shalt.err (!%p2463_p7)
}
0x15a9   :  { %s2501_s26 = smov 4   ;;  %v1175_v11 = vpop.permute.xlu1 %1174  ;;  %v1169_v5 = vpop.permute.xlu0 %1168 }
0x15aa   :  { %1884 = dma.vmem_to_hbm [thread:$0]  %s1879_s14, 128, %s3253_s7, [#allocation5], %s2498_s0, %s2498_s0, %s2501_s26  }
0x15ab   :  { %1930 = vst.msk [vmem:[%s3251_s5 + $0xc] sm:$0xf] %vm258_vm0, %v1175_v11  ;;  %s2502_s14 = smov [#allocation2]  }
0x15ac   :  { %1929 = vst.msk [vmem:[%s3251_s5 + $0x10] sm:$0xf] %vm251_vm5, %v1169_v5  ;;  %s1866_s15 = sshll.u32 %s2502_s14, 4  ;;  %s1867_s15 = int_to_ptr.vmem [resolvable:$true] %s1866_s15 }
0x15ad   :  { %v1395_v14 = vpop.permute.xlu1 %1394  ;;  %v1389_v23 = vpop.permute.xlu0 %1388  ;;  %s2467_s4 = scalar_lea.vmem %s1867_s15, 128  ;;  %p2472_p9 = scmp.lt.s32.totalorder %s1867_s15, %s1867_s15 }
0x15ae   :  { %1938 = vst.msk [vmem:[%s3251_s5 + $0x8] sm:$0xf] %vm258_vm0, %v1395_v14  ;;  %p2468_p8 = scmp.ne.s32.totalorder %s1867_s15, %s2467_s4  ;;  %p2473_p10 = scmp.lt.s32.totalorder %s2467_s4, %s2467_s4 }
0x15af   :  { %1937 = vst.msk [vmem:[%s3251_s5 + $0x14] sm:$0xf] %vm251_vm5, %v1389_v23 }
0x15b0   :  { %p2474_p11 = por %p2473_p10, %p2472_p9 }
0x15b1   :  { %v1615_v24 = vpop.permute.xlu1 %1614  ;;  %v1609_v25 = vpop.permute.xlu0 %1608 }
0x15b2   :  { %1946 = vst.msk [vmem:[%s3251_s5 + $0x4] sm:$0xf] %vm258_vm0, %v1615_v24  ;;  %p2475_p12 = pnand %p2474_p11, %p2468_p8 }
0x15b3   :  { %1945 = vst.msk [vmem:[%s3251_s5 + $0x18] sm:$0xf] %vm251_vm5, %v1609_v25 }
0x1602   :  { %v1839_v4 = vpop.permute.xlu0 %1838 }
0x1603   :  { %1841 = vst.msk [vmem:[#allocation2] sm:$0xf] %vm251_vm5, %v1839_v4 }
0x1606   :  { %v1844_v20 = vpop.permute.xlu1 %1843  ;;  %v1828_v29 = vpop.permute.xlu0 %1827 }
0x1607   :  { %1847 = vst.msk [vmem:[#allocation2 + $0x4] sm:$0xf] %vm251_vm5, %v1844_v20  ;;  %1952 = vst.msk [vmem:[%s3251_s5 + $0x1c] sm:$0xf] %vm251_vm5, %v1828_v29 }
0x1608   :  { %2478 = shalt.err (!%p2475_p12)
}
0x1609   :  { %s2479_s19 = scalar_lea.hbm %s3252_s6, 128 }
0x160a   :  { %p2480_p13 = scmp.ne.s32.totalorder %s3252_s6, %s2479_s19  ;;  %p2483_p0 = scmp.lt.u32.totalorder %s2479_s19, %s3252_s6 }
0x160c   :  { %p2485_p1 = pnand %p2483_p0, %p2480_p13 }
0x160e   :  { %2488 = shalt.err (!%p2485_p1)
}
0x160f   :  { %1872 = dma.vmem_to_hbm [thread:$0]  %s1867_s15, 128, %s3252_s6, [#allocation3], %s2498_s0, %s2498_s0, %s2501_s26   ;;  %v1834_v32 = vpop.permute.xlu1 %1833 }
0x1610   :  { %1836 = vst.msk [vmem:[%s3251_s5] sm:$0xf] %vm258_vm0, %v1834_v32 }
0x1611   :  { %2489 = dma.done.wait [#allocation3], 128  }
0x1612   :  { %2490 = vsyncadd [#allocation3], 4294967168 }
0x1613   :  { %2491 = dma.done.wait [#allocation5], 128  }
0x1614   :  { %2492 = vsyncadd [#allocation5], 4294967168 }
0x1615   :  { %1893 = vsyncpa [#allocation3], 1 }
0x1616   :  { %1894 = vsyncpa [#allocation5], 1 }

</bundles_post_ra>
